<compile_context>
chip_gen: v5e
topology: v5e:2x2
jax: 0.10.0
libtpu: 0.0.40
codegen_flags: <defaults>
</compile_context>

<pallas_src>
import math
import functools

import jax
import jax.numpy as jnp
from jax import lax
from jax.experimental import pallas as pl
from jax.experimental.pallas import tpu as pltpu


def bert_attention_kernel(mask_ref, x_ref, wq_ref, bq_ref, wk_ref, bk_ref,
                          wv_ref, bv_ref, wo_ref, bo_ref, gamma_ref, beta_ref,
                          out_ref, k_sc, v_sc, *, eps):
    """One (batch, query-tile) grid step of the fused BERT attention block.

    Kernel-visible shapes:
      mask_ref : (1, 1, 1, S) f32   additive attention mask
      x_ref    : (1, S, H)    f32   hidden states (full sequence of this batch)
      wq/wk/wv : (NH, H, DH)  bf16  per-head projection weights (wq pre-scaled)
      bq/bk/bv : (NH, 1, DH)  f32
      wo       : (NH, DH, H)  bf16
      bo/gamma/beta : (1, H)  f32
      out_ref  : (1, TQ, H)
      k_sc/v_sc: (NH, S, DH)  bf16  K / V cached per batch in VMEM scratch
    """
    num_heads = wq_ref.shape[0]
    S = x_ref.shape[1]
    H = x_ref.shape[2]
    tq = out_ref.shape[1]
    qi = pl.program_id(1)

    # --- K / V for the whole sequence: compute once per batch (query-tile 0) ---
    @pl.when(qi == 0)
    def _():
        x_full = x_ref[0].astype(jnp.bfloat16)                      # (S, H)
        for h in range(num_heads):                                  # static head loop
            kh = jnp.dot(x_full, wk_ref[h],
                         preferred_element_type=jnp.float32) + bk_ref[h]
            vh = jnp.dot(x_full, wv_ref[h],
                         preferred_element_type=jnp.float32) + bv_ref[h]
            k_sc[h] = kh.astype(jnp.bfloat16)
            v_sc[h] = vh.astype(jnp.bfloat16)

    # --- query tile: residual kept in f32, matmul operands cast to bf16 ---
    row0 = pl.multiple_of(qi * tq, tq)
    x_tile = x_ref[0, pl.ds(row0, tq), :]                           # (TQ, H) f32
    x_tile_bf = x_tile.astype(jnp.bfloat16)

    # additive mask, broadcast once (hoisted out of the head loop)
    mask_tile = jnp.broadcast_to(mask_ref[...].reshape(1, S), (tq, S))

    y = jnp.zeros((tq, H), jnp.float32)
    for h in range(num_heads):                                      # static head loop
        # Q projection; 1/sqrt(DH) already folded into wq / bq host-side.
        qh = jnp.dot(x_tile_bf, wq_ref[h],
                     preferred_element_type=jnp.float32) + bq_ref[h]
        # scores = q @ k^T as an NT contraction (no explicit transpose)
        scores = lax.dot_general(
            qh.astype(jnp.bfloat16), k_sc[h],
            dimension_numbers=(((1,), (1,)), ((), ())),
            preferred_element_type=jnp.float32)
        scores = scores + mask_tile
        # softmax in f32; reciprocal runs in the EUP slot
        m = jnp.max(scores, axis=-1, keepdims=True)
        e = jnp.exp(scores - m)
        denom = jnp.sum(e, axis=-1, keepdims=True)
        p = (e * pl.reciprocal(denom, approx=True)).astype(jnp.bfloat16)
        ctx_h = jnp.dot(p, v_sc[h], preferred_element_type=jnp.float32)
        # output projection fused into the head loop (replaces the lane-axis concat)
        y = y + jnp.dot(ctx_h.astype(jnp.bfloat16), wo_ref[h],
                        preferred_element_type=jnp.float32)

    # --- output bias + residual + LayerNorm (all f32, eps inside rsqrt) ---
    y = y + bo_ref[...] + x_tile
    mu = jnp.mean(y, axis=-1, keepdims=True)
    var = jnp.mean(jnp.square(y - mu), axis=-1, keepdims=True)
    y = (y - mu) * lax.rsqrt(var + eps)
    y = y * gamma_ref[...] + beta_ref[...]
    out_ref[0] = y.astype(out_ref.dtype)


def quant_bert_attention(x, mask, params, *, num_heads, eps=1e-12, tq=None):
    """x: (B, S, H) f32, mask: (B, 1, 1, S) additive, params: tuple of weights.

    Linear weights are stored pre-transposed as (H_in, H_out) so the layer computes
    x @ W + b (equivalent to torch's x @ W.T with W of shape (out, in)).
    """
    wq, bq, wk, bk, wv, bv, wo, bo, gamma, beta = params
    B, S, H = x.shape
    dh = H // num_heads
    assert num_heads * dh == H

    # query-tile size: a multiple of 8 (sublane) that divides S, else the full sequence
    if tq is None:
        tq = min(S, 256)
    if S % tq != 0 or (tq % 8 != 0 and tq != S):
        tq = S
    n_q = S // tq

    scale = 1.0 / math.sqrt(dh)

    # Host-side weight prep: fold the softmax scale into the query projection, split
    # weights per head along a leading axis, cast matmul operands to bf16.
    def per_head_in(w):            # (H, H) -> (NH, H, DH)
        return w.reshape(H, num_heads, dh).transpose(1, 0, 2)

    def per_head_bias(b):          # (H,) or (1, H) -> (NH, 1, DH)
        return jnp.asarray(b).reshape(num_heads, 1, dh).astype(jnp.float32)

    wq_h = per_head_in(wq * scale).astype(jnp.bfloat16)
    wk_h = per_head_in(wk).astype(jnp.bfloat16)
    wv_h = per_head_in(wv).astype(jnp.bfloat16)
    wo_h = wo.reshape(num_heads, dh, H).astype(jnp.bfloat16)       # (NH, DH, H)
    bq_h = per_head_bias(jnp.asarray(bq) * scale)
    bk_h = per_head_bias(bk)
    bv_h = per_head_bias(bv)
    bo_r = jnp.asarray(bo).reshape(1, H).astype(jnp.float32)
    gamma_r = jnp.asarray(gamma).reshape(1, H).astype(jnp.float32)
    beta_r = jnp.asarray(beta).reshape(1, H).astype(jnp.float32)

    kernel = functools.partial(bert_attention_kernel, eps=eps)

    w_in_spec = pl.BlockSpec((num_heads, H, dh), lambda b, q: (0, 0, 0))
    b_in_spec = pl.BlockSpec((num_heads, 1, dh), lambda b, q: (0, 0, 0))
    row_spec = pl.BlockSpec((1, H), lambda b, q: (0, 0))

    return pl.pallas_call(
        kernel,
        out_shape=jax.ShapeDtypeStruct((B, S, H), x.dtype),
        grid_spec=pltpu.PrefetchScalarGridSpec(
            num_scalar_prefetch=0,
            grid=(B, n_q),
            in_specs=[
                pl.BlockSpec((1, 1, 1, S), lambda b, q: (b, 0, 0, 0)),  # mask
                pl.BlockSpec((1, S, H), lambda b, q: (b, 0, 0)),        # hidden_states
                w_in_spec, b_in_spec,    # Wq (scaled), bq (scaled)
                w_in_spec, b_in_spec,    # Wk, bk
                w_in_spec, b_in_spec,    # Wv, bv
                pl.BlockSpec((num_heads, dh, H), lambda b, q: (0, 0, 0)),  # Wo
                row_spec,                # bo
                row_spec, row_spec,      # gamma, beta
            ],
            out_specs=pl.BlockSpec((1, tq, H), lambda b, q: (b, q, 0)),
            scratch_shapes=[
                pltpu.VMEM((num_heads, S, dh), jnp.bfloat16),   # K cache (per batch)
                pltpu.VMEM((num_heads, S, dh), jnp.bfloat16),   # V cache (per batch)
            ],
        ),
        compiler_params=pltpu.CompilerParams(
            # K/V scratch is filled at q-tile 0 of each batch, so the q axis must be
            # "arbitrary" (sequential per core); batch is megacore-parallel.
            dimension_semantics=("parallel", "arbitrary"),
            vmem_limit_bytes=48 * 1024 * 1024,
        ),
    )(mask, x, wq_h, bq_h, wk_h, bk_h, wv_h, bv_h, wo_h, bo_r, gamma_r, beta_r)


def reference(x, mask, params, *, num_heads, eps=1e-12):
    """Pure-JAX f32 reference mirroring the PyTorch forward (quantization disabled)."""
    wq, bq, wk, bk, wv, bv, wo, bo, gamma, beta = params
    B, S, H = x.shape
    dh = H // num_heads

    def proj(w, b):
        return x @ w + b

    def split(t):
        return t.reshape(B, S, num_heads, dh).transpose(0, 2, 1, 3)

    q, k, v = split(proj(wq, bq)), split(proj(wk, bk)), split(proj(wv, bv))
    scores = jnp.einsum('bhqd,bhkd->bhqk', q, k) / math.sqrt(dh) + mask
    p = jax.nn.softmax(scores, axis=-1)
    ctx = jnp.einsum('bhqk,bhkd->bhqd', p, v).transpose(0, 2, 1, 3).reshape(B, S, H)
    y = ctx @ wo + bo + x
    mu = y.mean(-1, keepdims=True)
    var = ((y - mu) ** 2).mean(-1, keepdims=True)
    return (y - mu) / jnp.sqrt(var + eps) * gamma + beta


if __name__ == "__main__":
    B, S, H, NH = 2, 16, 32, 4          # small demo; tq=8 exercises the q-tiling path

    key = jax.random.PRNGKey(0)
    keys = jax.random.split(key, 12)

    def winit(k):
        return (0.02 * jax.random.normal(k, (H, H))).astype(jnp.float32)

    def binit(k):
        return (0.01 * jax.random.normal(k, (1, H))).astype(jnp.float32)

    wq, wk, wv, wo = winit(keys[0]), winit(keys[1]), winit(keys[2]), winit(keys[3])
    bq, bk, bv, bo = binit(keys[4]), binit(keys[5]), binit(keys[6]), binit(keys[7])
    gamma = (1.0 + 0.05 * jax.random.normal(keys[8], (1, H))).astype(jnp.float32)
    beta = (0.05 * jax.random.normal(keys[9], (1, H))).astype(jnp.float32)
    params = (wq, bq, wk, bk, wv, bv, wo, bo, gamma, beta)

    x = jax.random.normal(keys[10], (B, S, H), dtype=jnp.float32)

    # BERT-style additive attention mask: mask out the last 4 keys of batch 1.
    mask = jnp.zeros((B, 1, 1, S), dtype=jnp.float32)
    mask = mask.at[1, 0, 0, -4:].set(-10000.0)

    out = quant_bert_attention(x, mask, params, num_heads=NH, tq=8)
    out = jax.block_until_ready(out)

    ref = reference(x, mask, params, num_heads=NH)
    assert out.shape == (B, S, H)
    # bf16 matmul inputs + approx reciprocal -> validate at a bf16-appropriate tolerance
    err = float(jnp.max(jnp.abs(out - ref)))
    assert jnp.allclose(out, ref, atol=2e-2, rtol=2e-2), err

    print("KERNEL_OK")
</pallas_src>

<mosaic_0001>
module attributes {stable_mosaic.version = 11 : i64} {
  func.func @bert_attention_kernel(%arg0: i32, %arg1: i32, %arg2: memref<1x1x1x16xf32, #tpu.memory_space<vmem>>, %arg3: memref<1x16x32xf32, #tpu.memory_space<vmem>>, %arg4: memref<4x32x8xbf16, #tpu.memory_space<vmem>>, %arg5: memref<4x1x8xf32, #tpu.memory_space<vmem>>, %arg6: memref<4x32x8xbf16, #tpu.memory_space<vmem>>, %arg7: memref<4x1x8xf32, #tpu.memory_space<vmem>>, %arg8: memref<4x32x8xbf16, #tpu.memory_space<vmem>>, %arg9: memref<4x1x8xf32, #tpu.memory_space<vmem>>, %arg10: memref<4x8x32xbf16, #tpu.memory_space<vmem>>, %arg11: memref<1x32xf32, #tpu.memory_space<vmem>>, %arg12: memref<1x32xf32, #tpu.memory_space<vmem>>, %arg13: memref<1x32xf32, #tpu.memory_space<vmem>>, %arg14: memref<1x8x32xf32, #tpu.memory_space<vmem>>, %arg15: memref<4x16x8xbf16, #tpu.memory_space<vmem>>, %arg16: memref<4x16x8xbf16, #tpu.memory_space<vmem>>) attributes {dimension_semantics = [#tpu.dimension_semantics<parallel>, #tpu.dimension_semantics<arbitrary>], iteration_bounds = array<i64: 2, 2>, scalar_prefetch = 0 : i64, scratch_operands = 2 : i64, tpu.core_type = #tpu.core_type<tc>, window_params = [{transform_indices = @transform_0, window_bounds = array<i64: 1, 1, 1, 16>}, {transform_indices = @transform_1, window_bounds = array<i64: 1, 16, 32>}, {pipeline_mode = #tpu.pipeline_mode<synchronous>, transform_indices = @transform_2, window_bounds = array<i64: 4, 32, 8>}, {pipeline_mode = #tpu.pipeline_mode<synchronous>, transform_indices = @transform_3, window_bounds = array<i64: 4, 1, 8>}, {pipeline_mode = #tpu.pipeline_mode<synchronous>, transform_indices = @transform_4, window_bounds = array<i64: 4, 32, 8>}, {pipeline_mode = #tpu.pipeline_mode<synchronous>, transform_indices = @transform_5, window_bounds = array<i64: 4, 1, 8>}, {pipeline_mode = #tpu.pipeline_mode<synchronous>, transform_indices = @transform_6, window_bounds = array<i64: 4, 32, 8>}, {pipeline_mode = #tpu.pipeline_mode<synchronous>, transform_indices = @transform_7, window_bounds = array<i64: 4, 1, 8>}, {pipeline_mode = #tpu.pipeline_mode<synchronous>, transform_indices = @transform_8, window_bounds = array<i64: 4, 8, 32>}, {pipeline_mode = #tpu.pipeline_mode<synchronous>, transform_indices = @transform_9, window_bounds = array<i64: 1, 32>}, {pipeline_mode = #tpu.pipeline_mode<synchronous>, transform_indices = @transform_10, window_bounds = array<i64: 1, 32>}, {pipeline_mode = #tpu.pipeline_mode<synchronous>, transform_indices = @transform_11, window_bounds = array<i64: 1, 32>}, {transform_indices = @transform_12, window_bounds = array<i64: 1, 8, 32>}]} {
    %c0_i32 = arith.constant 0 : i32
    %0 = arith.cmpi eq, %arg1, %c0_i32 : i32
    %1 = arith.extui %0 : i1 to i32
    %c0_i32_0 = arith.constant 0 : i32
    %2 = arith.cmpi ne, %1, %c0_i32_0 : i32
    scf.if %2 {
      %c0_101 = arith.constant 0 : index
      %c0_102 = arith.constant 0 : index
      %c0_103 = arith.constant 0 : index
      %169 = vector.load %arg3[%c0_101, %c0_102, %c0_103] : memref<1x16x32xf32, #tpu.memory_space<vmem>>, vector<1x16x32xf32>
      %170 = vector.shape_cast %169 : vector<1x16x32xf32> to vector<16x32xf32>
      %171 = arith.truncf %170 : vector<16x32xf32> to vector<16x32xbf16>
      %c0_104 = arith.constant 0 : index
      %c0_105 = arith.constant 0 : index
      %c0_106 = arith.constant 0 : index
      %172 = vector.load %arg6[%c0_104, %c0_105, %c0_106] : memref<4x32x8xbf16, #tpu.memory_space<vmem>>, vector<1x32x8xbf16>
      %173 = vector.shape_cast %172 : vector<1x32x8xbf16> to vector<32x8xbf16>
      %cst_107 = arith.constant dense<0.000000e+00> : vector<16x8xf32>
      %174 = tpu.matmul %171, %173, %cst_107 {dimension_numbers = #tpu.dot_dimension_numbers<[1], [0], [0], [1], [0, 0, 1, 1], [], []>} : vector<16x32xbf16>, vector<32x8xbf16>, vector<16x8xf32> -> vector<16x8xf32>
      %c0_108 = arith.constant 0 : index
      %c0_109 = arith.constant 0 : index
      %c0_110 = arith.constant 0 : index
      %175 = vector.load %arg7[%c0_108, %c0_109, %c0_110] : memref<4x1x8xf32, #tpu.memory_space<vmem>>, vector<1x1x8xf32>
      %176 = vector.shape_cast %175 : vector<1x1x8xf32> to vector<1x8xf32>
      %177 = vector.broadcast %176 : vector<1x8xf32> to vector<16x8xf32>
      %178 = arith.addf %174, %177 : vector<16x8xf32>
      %c0_111 = arith.constant 0 : index
      %c0_112 = arith.constant 0 : index
      %c0_113 = arith.constant 0 : index
      %179 = vector.load %arg8[%c0_111, %c0_112, %c0_113] : memref<4x32x8xbf16, #tpu.memory_space<vmem>>, vector<1x32x8xbf16>
      %180 = vector.shape_cast %179 : vector<1x32x8xbf16> to vector<32x8xbf16>
      %cst_114 = arith.constant dense<0.000000e+00> : vector<16x8xf32>
      %181 = tpu.matmul %171, %180, %cst_114 {dimension_numbers = #tpu.dot_dimension_numbers<[1], [0], [0], [1], [0, 0, 1, 1], [], []>} : vector<16x32xbf16>, vector<32x8xbf16>, vector<16x8xf32> -> vector<16x8xf32>
      %c0_115 = arith.constant 0 : index
      %c0_116 = arith.constant 0 : index
      %c0_117 = arith.constant 0 : index
      %182 = vector.load %arg9[%c0_115, %c0_116, %c0_117] : memref<4x1x8xf32, #tpu.memory_space<vmem>>, vector<1x1x8xf32>
      %183 = vector.shape_cast %182 : vector<1x1x8xf32> to vector<1x8xf32>
      %184 = vector.broadcast %183 : vector<1x8xf32> to vector<16x8xf32>
      %185 = arith.addf %181, %184 : vector<16x8xf32>
      %186 = arith.truncf %178 : vector<16x8xf32> to vector<16x8xbf16>
      %c0_118 = arith.constant 0 : index
      %c0_119 = arith.constant 0 : index
      %c0_120 = arith.constant 0 : index
      %187 = vector.load %arg15[%c0_118, %c0_119, %c0_120] : memref<4x16x8xbf16, #tpu.memory_space<vmem>>, vector<1x16x8xbf16>
      %188 = vector.shape_cast %187 : vector<1x16x8xbf16> to vector<16x8xbf16>
      %189 = vector.shape_cast %186 : vector<16x8xbf16> to vector<1x16x8xbf16>
      tpu.vector_store %arg15[%c0_118, %c0_119, %c0_120], %189 {strides = array<i32>} : memref<4x16x8xbf16, #tpu.memory_space<vmem>>, vector<1x16x8xbf16>,
      %190 = arith.truncf %185 : vector<16x8xf32> to vector<16x8xbf16>
      %c0_121 = arith.constant 0 : index
      %c0_122 = arith.constant 0 : index
      %c0_123 = arith.constant 0 : index
      %191 = vector.load %arg16[%c0_121, %c0_122, %c0_123] : memref<4x16x8xbf16, #tpu.memory_space<vmem>>, vector<1x16x8xbf16>
      %192 = vector.shape_cast %191 : vector<1x16x8xbf16> to vector<16x8xbf16>
      %193 = vector.shape_cast %190 : vector<16x8xbf16> to vector<1x16x8xbf16>
      tpu.vector_store %arg16[%c0_121, %c0_122, %c0_123], %193 {strides = array<i32>} : memref<4x16x8xbf16, #tpu.memory_space<vmem>>, vector<1x16x8xbf16>,
      %c1_124 = arith.constant 1 : index
      %c0_125 = arith.constant 0 : index
      %c0_126 = arith.constant 0 : index
      %194 = vector.load %arg6[%c1_124, %c0_125, %c0_126] : memref<4x32x8xbf16, #tpu.memory_space<vmem>>, vector<1x32x8xbf16>
      %195 = vector.shape_cast %194 : vector<1x32x8xbf16> to vector<32x8xbf16>
      %cst_127 = arith.constant dense<0.000000e+00> : vector<16x8xf32>
      %196 = tpu.matmul %171, %195, %cst_127 {dimension_numbers = #tpu.dot_dimension_numbers<[1], [0], [0], [1], [0, 0, 1, 1], [], []>} : vector<16x32xbf16>, vector<32x8xbf16>, vector<16x8xf32> -> vector<16x8xf32>
      %c1_128 = arith.constant 1 : index
      %c0_129 = arith.constant 0 : index
      %c0_130 = arith.constant 0 : index
      %197 = vector.load %arg7[%c1_128, %c0_129, %c0_130] : memref<4x1x8xf32, #tpu.memory_space<vmem>>, vector<1x1x8xf32>
      %198 = vector.shape_cast %197 : vector<1x1x8xf32> to vector<1x8xf32>
      %199 = vector.broadcast %198 : vector<1x8xf32> to vector<16x8xf32>
      %200 = arith.addf %196, %199 : vector<16x8xf32>
      %c1_131 = arith.constant 1 : index
      %c0_132 = arith.constant 0 : index
      %c0_133 = arith.constant 0 : index
      %201 = vector.load %arg8[%c1_131, %c0_132, %c0_133] : memref<4x32x8xbf16, #tpu.memory_space<vmem>>, vector<1x32x8xbf16>
      %202 = vector.shape_cast %201 : vector<1x32x8xbf16> to vector<32x8xbf16>
      %cst_134 = arith.constant dense<0.000000e+00> : vector<16x8xf32>
      %203 = tpu.matmul %171, %202, %cst_134 {dimension_numbers = #tpu.dot_dimension_numbers<[1], [0], [0], [1], [0, 0, 1, 1], [], []>} : vector<16x32xbf16>, vector<32x8xbf16>, vector<16x8xf32> -> vector<16x8xf32>
      %c1_135 = arith.constant 1 : index
      %c0_136 = arith.constant 0 : index
      %c0_137 = arith.constant 0 : index
      %204 = vector.load %arg9[%c1_135, %c0_136, %c0_137] : memref<4x1x8xf32, #tpu.memory_space<vmem>>, vector<1x1x8xf32>
      %205 = vector.shape_cast %204 : vector<1x1x8xf32> to vector<1x8xf32>
      %206 = vector.broadcast %205 : vector<1x8xf32> to vector<16x8xf32>
      %207 = arith.addf %203, %206 : vector<16x8xf32>
      %208 = arith.truncf %200 : vector<16x8xf32> to vector<16x8xbf16>
      %c1_138 = arith.constant 1 : index
      %c0_139 = arith.constant 0 : index
      %c0_140 = arith.constant 0 : index
      %209 = vector.load %arg15[%c1_138, %c0_139, %c0_140] : memref<4x16x8xbf16, #tpu.memory_space<vmem>>, vector<1x16x8xbf16>
      %210 = vector.shape_cast %209 : vector<1x16x8xbf16> to vector<16x8xbf16>
      %211 = vector.shape_cast %208 : vector<16x8xbf16> to vector<1x16x8xbf16>
      tpu.vector_store %arg15[%c1_138, %c0_139, %c0_140], %211 {strides = array<i32>} : memref<4x16x8xbf16, #tpu.memory_space<vmem>>, vector<1x16x8xbf16>,
      %212 = arith.truncf %207 : vector<16x8xf32> to vector<16x8xbf16>
      %c1_141 = arith.constant 1 : index
      %c0_142 = arith.constant 0 : index
      %c0_143 = arith.constant 0 : index
      %213 = vector.load %arg16[%c1_141, %c0_142, %c0_143] : memref<4x16x8xbf16, #tpu.memory_space<vmem>>, vector<1x16x8xbf16>
      %214 = vector.shape_cast %213 : vector<1x16x8xbf16> to vector<16x8xbf16>
      %215 = vector.shape_cast %212 : vector<16x8xbf16> to vector<1x16x8xbf16>
      tpu.vector_store %arg16[%c1_141, %c0_142, %c0_143], %215 {strides = array<i32>} : memref<4x16x8xbf16, #tpu.memory_space<vmem>>, vector<1x16x8xbf16>,
      %c2_144 = arith.constant 2 : index
      %c0_145 = arith.constant 0 : index
      %c0_146 = arith.constant 0 : index
      %216 = vector.load %arg6[%c2_144, %c0_145, %c0_146] : memref<4x32x8xbf16, #tpu.memory_space<vmem>>, vector<1x32x8xbf16>
      %217 = vector.shape_cast %216 : vector<1x32x8xbf16> to vector<32x8xbf16>
      %cst_147 = arith.constant dense<0.000000e+00> : vector<16x8xf32>
      %218 = tpu.matmul %171, %217, %cst_147 {dimension_numbers = #tpu.dot_dimension_numbers<[1], [0], [0], [1], [0, 0, 1, 1], [], []>} : vector<16x32xbf16>, vector<32x8xbf16>, vector<16x8xf32> -> vector<16x8xf32>
      %c2_148 = arith.constant 2 : index
      %c0_149 = arith.constant 0 : index
      %c0_150 = arith.constant 0 : index
      %219 = vector.load %arg7[%c2_148, %c0_149, %c0_150] : memref<4x1x8xf32, #tpu.memory_space<vmem>>, vector<1x1x8xf32>
      %220 = vector.shape_cast %219 : vector<1x1x8xf32> to vector<1x8xf32>
      %221 = vector.broadcast %220 : vector<1x8xf32> to vector<16x8xf32>
      %222 = arith.addf %218, %221 : vector<16x8xf32>
      %c2_151 = arith.constant 2 : index
      %c0_152 = arith.constant 0 : index
      %c0_153 = arith.constant 0 : index
      %223 = vector.load %arg8[%c2_151, %c0_152, %c0_153] : memref<4x32x8xbf16, #tpu.memory_space<vmem>>, vector<1x32x8xbf16>
      %224 = vector.shape_cast %223 : vector<1x32x8xbf16> to vector<32x8xbf16>
      %cst_154 = arith.constant dense<0.000000e+00> : vector<16x8xf32>
      %225 = tpu.matmul %171, %224, %cst_154 {dimension_numbers = #tpu.dot_dimension_numbers<[1], [0], [0], [1], [0, 0, 1, 1], [], []>} : vector<16x32xbf16>, vector<32x8xbf16>, vector<16x8xf32> -> vector<16x8xf32>
      %c2_155 = arith.constant 2 : index
      %c0_156 = arith.constant 0 : index
      %c0_157 = arith.constant 0 : index
      %226 = vector.load %arg9[%c2_155, %c0_156, %c0_157] : memref<4x1x8xf32, #tpu.memory_space<vmem>>, vector<1x1x8xf32>
      %227 = vector.shape_cast %226 : vector<1x1x8xf32> to vector<1x8xf32>
      %228 = vector.broadcast %227 : vector<1x8xf32> to vector<16x8xf32>
      %229 = arith.addf %225, %228 : vector<16x8xf32>
      %230 = arith.truncf %222 : vector<16x8xf32> to vector<16x8xbf16>
      %c2_158 = arith.constant 2 : index
      %c0_159 = arith.constant 0 : index
      %c0_160 = arith.constant 0 : index
      %231 = vector.load %arg15[%c2_158, %c0_159, %c0_160] : memref<4x16x8xbf16, #tpu.memory_space<vmem>>, vector<1x16x8xbf16>
      %232 = vector.shape_cast %231 : vector<1x16x8xbf16> to vector<16x8xbf16>
      %233 = vector.shape_cast %230 : vector<16x8xbf16> to vector<1x16x8xbf16>
      tpu.vector_store %arg15[%c2_158, %c0_159, %c0_160], %233 {strides = array<i32>} : memref<4x16x8xbf16, #tpu.memory_space<vmem>>, vector<1x16x8xbf16>,
      %234 = arith.truncf %229 : vector<16x8xf32> to vector<16x8xbf16>
      %c2_161 = arith.constant 2 : index
      %c0_162 = arith.constant 0 : index
      %c0_163 = arith.constant 0 : index
      %235 = vector.load %arg16[%c2_161, %c0_162, %c0_163] : memref<4x16x8xbf16, #tpu.memory_space<vmem>>, vector<1x16x8xbf16>
      %236 = vector.shape_cast %235 : vector<1x16x8xbf16> to vector<16x8xbf16>
      %237 = vector.shape_cast %234 : vector<16x8xbf16> to vector<1x16x8xbf16>
      tpu.vector_store %arg16[%c2_161, %c0_162, %c0_163], %237 {strides = array<i32>} : memref<4x16x8xbf16, #tpu.memory_space<vmem>>, vector<1x16x8xbf16>,
      %c3_164 = arith.constant 3 : index
      %c0_165 = arith.constant 0 : index
      %c0_166 = arith.constant 0 : index
      %238 = vector.load %arg6[%c3_164, %c0_165, %c0_166] : memref<4x32x8xbf16, #tpu.memory_space<vmem>>, vector<1x32x8xbf16>
      %239 = vector.shape_cast %238 : vector<1x32x8xbf16> to vector<32x8xbf16>
      %cst_167 = arith.constant dense<0.000000e+00> : vector<16x8xf32>
      %240 = tpu.matmul %171, %239, %cst_167 {dimension_numbers = #tpu.dot_dimension_numbers<[1], [0], [0], [1], [0, 0, 1, 1], [], []>} : vector<16x32xbf16>, vector<32x8xbf16>, vector<16x8xf32> -> vector<16x8xf32>
      %c3_168 = arith.constant 3 : index
      %c0_169 = arith.constant 0 : index
      %c0_170 = arith.constant 0 : index
      %241 = vector.load %arg7[%c3_168, %c0_169, %c0_170] : memref<4x1x8xf32, #tpu.memory_space<vmem>>, vector<1x1x8xf32>
      %242 = vector.shape_cast %241 : vector<1x1x8xf32> to vector<1x8xf32>
      %243 = vector.broadcast %242 : vector<1x8xf32> to vector<16x8xf32>
      %244 = arith.addf %240, %243 : vector<16x8xf32>
      %c3_171 = arith.constant 3 : index
      %c0_172 = arith.constant 0 : index
      %c0_173 = arith.constant 0 : index
      %245 = vector.load %arg8[%c3_171, %c0_172, %c0_173] : memref<4x32x8xbf16, #tpu.memory_space<vmem>>, vector<1x32x8xbf16>
      %246 = vector.shape_cast %245 : vector<1x32x8xbf16> to vector<32x8xbf16>
      %cst_174 = arith.constant dense<0.000000e+00> : vector<16x8xf32>
      %247 = tpu.matmul %171, %246, %cst_174 {dimension_numbers = #tpu.dot_dimension_numbers<[1], [0], [0], [1], [0, 0, 1, 1], [], []>} : vector<16x32xbf16>, vector<32x8xbf16>, vector<16x8xf32> -> vector<16x8xf32>
      %c3_175 = arith.constant 3 : index
      %c0_176 = arith.constant 0 : index
      %c0_177 = arith.constant 0 : index
      %248 = vector.load %arg9[%c3_175, %c0_176, %c0_177] : memref<4x1x8xf32, #tpu.memory_space<vmem>>, vector<1x1x8xf32>
      %249 = vector.shape_cast %248 : vector<1x1x8xf32> to vector<1x8xf32>
      %250 = vector.broadcast %249 : vector<1x8xf32> to vector<16x8xf32>
      %251 = arith.addf %247, %250 : vector<16x8xf32>
      %252 = arith.truncf %244 : vector<16x8xf32> to vector<16x8xbf16>
      %c3_178 = arith.constant 3 : index
      %c0_179 = arith.constant 0 : index
      %c0_180 = arith.constant 0 : index
      %253 = vector.load %arg15[%c3_178, %c0_179, %c0_180] : memref<4x16x8xbf16, #tpu.memory_space<vmem>>, vector<1x16x8xbf16>
      %254 = vector.shape_cast %253 : vector<1x16x8xbf16> to vector<16x8xbf16>
      %255 = vector.shape_cast %252 : vector<16x8xbf16> to vector<1x16x8xbf16>
      tpu.vector_store %arg15[%c3_178, %c0_179, %c0_180], %255 {strides = array<i32>} : memref<4x16x8xbf16, #tpu.memory_space<vmem>>, vector<1x16x8xbf16>,
      %256 = arith.truncf %251 : vector<16x8xf32> to vector<16x8xbf16>
      %c3_181 = arith.constant 3 : index
      %c0_182 = arith.constant 0 : index
      %c0_183 = arith.constant 0 : index
      %257 = vector.load %arg16[%c3_181, %c0_182, %c0_183] : memref<4x16x8xbf16, #tpu.memory_space<vmem>>, vector<1x16x8xbf16>
      %258 = vector.shape_cast %257 : vector<1x16x8xbf16> to vector<16x8xbf16>
      %259 = vector.shape_cast %256 : vector<16x8xbf16> to vector<1x16x8xbf16>
      tpu.vector_store %arg16[%c3_181, %c0_182, %c0_183], %259 {strides = array<i32>} : memref<4x16x8xbf16, #tpu.memory_space<vmem>>, vector<1x16x8xbf16>,
    } else {
    }
    %c8_i32 = arith.constant 8 : i32
    %3 = arith.muli %arg1, %c8_i32 : i32
    %4 = tpu.assume_multiple %3, 8 : i32
    %c0 = arith.constant 0 : index
    %5 = arith.index_cast %4 : i32 to index
    %c0_1 = arith.constant 0 : index
    %6 = vector.load %arg3[%c0, %5, %c0_1] : memref<1x16x32xf32, #tpu.memory_space<vmem>>, vector<1x8x32xf32>
    %7 = vector.shape_cast %6 : vector<1x8x32xf32> to vector<8x32xf32>
    %8 = arith.truncf %7 : vector<8x32xf32> to vector<8x32xbf16>
    %c0_2 = arith.constant 0 : index
    %c0_3 = arith.constant 0 : index
    %c0_4 = arith.constant 0 : index
    %c0_5 = arith.constant 0 : index
    %9 = vector.load %arg2[%c0_2, %c0_3, %c0_4, %c0_5] : memref<1x1x1x16xf32, #tpu.memory_space<vmem>>, vector<1x1x1x16xf32>
    %10 = vector.shape_cast %9 : vector<1x1x1x16xf32> to vector<1x16xf32>
    %11 = vector.shape_cast %10 : vector<1x16xf32> to vector<1x16xf32>
    %12 = vector.broadcast %11 : vector<1x16xf32> to vector<8x16xf32>
    %cst = arith.constant 0.000000e+00 : f32
    %13 = vector.broadcast %cst : f32 to vector<8x32xf32>
    %c0_6 = arith.constant 0 : index
    %c0_7 = arith.constant 0 : index
    %c0_8 = arith.constant 0 : index
    %14 = vector.load %arg4[%c0_6, %c0_7, %c0_8] : memref<4x32x8xbf16, #tpu.memory_space<vmem>>, vector<1x32x8xbf16>
    %15 = vector.shape_cast %14 : vector<1x32x8xbf16> to vector<32x8xbf16>
    %cst_9 = arith.constant dense<0.000000e+00> : vector<8x8xf32>
    %16 = tpu.matmul %8, %15, %cst_9 {dimension_numbers = #tpu.dot_dimension_numbers<[1], [0], [0], [1], [0, 0, 1, 1], [], []>} : vector<8x32xbf16>, vector<32x8xbf16>, vector<8x8xf32> -> vector<8x8xf32>
    %c0_10 = arith.constant 0 : index
    %c0_11 = arith.constant 0 : index
    %c0_12 = arith.constant 0 : index
    %17 = vector.load %arg5[%c0_10, %c0_11, %c0_12] : memref<4x1x8xf32, #tpu.memory_space<vmem>>, vector<1x1x8xf32>
    %18 = vector.shape_cast %17 : vector<1x1x8xf32> to vector<1x8xf32>
    %19 = vector.broadcast %18 : vector<1x8xf32> to vector<8x8xf32>
    %20 = arith.addf %16, %19 : vector<8x8xf32>
    %21 = arith.truncf %20 : vector<8x8xf32> to vector<8x8xbf16>
    %c0_13 = arith.constant 0 : index
    %c0_14 = arith.constant 0 : index
    %c0_15 = arith.constant 0 : index
    %22 = vector.load %arg15[%c0_13, %c0_14, %c0_15] : memref<4x16x8xbf16, #tpu.memory_space<vmem>>, vector<1x16x8xbf16>
    %23 = vector.shape_cast %22 : vector<1x16x8xbf16> to vector<16x8xbf16>
    %cst_16 = arith.constant dense<0.000000e+00> : vector<8x16xf32>
    %24 = tpu.matmul %21, %23, %cst_16 {dimension_numbers = #tpu.dot_dimension_numbers<[1], [1], [0], [0], [0, 0, 1, 0], [], []>} : vector<8x8xbf16>, vector<16x8xbf16>, vector<8x16xf32> -> vector<8x16xf32>
    %25 = arith.addf %24, %12 : vector<8x16xf32>
    %cst_17 = arith.constant dense<0xFF800000> : vector<8xf32>
    %26 = vector.multi_reduction <maximumf>, %25, %cst_17 [1] : vector<8x16xf32> to vector<8xf32>
    %27 = vector.shape_cast %26 : vector<8xf32> to vector<8x1xf32>
    %28 = vector.broadcast %27 : vector<8x1xf32> to vector<8x16xf32>
    %29 = arith.subf %25, %28 : vector<8x16xf32>
    %30 = math.exp %29 : vector<8x16xf32>
    %cst_18 = arith.constant dense<0.000000e+00> : vector<8xf32>
    %31 = vector.multi_reduction <add>, %30, %cst_18 [1] : vector<8x16xf32> to vector<8xf32>
    %32 = vector.shape_cast %31 : vector<8xf32> to vector<8x1xf32>
    %33 = tpu.reciprocal %32 {approx = true} : vector<8x1xf32> -> vector<8x1xf32>
    %34 = vector.broadcast %33 : vector<8x1xf32> to vector<8x16xf32>
    %35 = arith.mulf %30, %34 : vector<8x16xf32>
    %36 = arith.truncf %35 : vector<8x16xf32> to vector<8x16xbf16>
    %c0_19 = arith.constant 0 : index
    %c0_20 = arith.constant 0 : index
    %c0_21 = arith.constant 0 : index
    %37 = vector.load %arg16[%c0_19, %c0_20, %c0_21] : memref<4x16x8xbf16, #tpu.memory_space<vmem>>, vector<1x16x8xbf16>
    %38 = vector.shape_cast %37 : vector<1x16x8xbf16> to vector<16x8xbf16>
    %cst_22 = arith.constant dense<0.000000e+00> : vector<8x8xf32>
    %39 = tpu.matmul %36, %38, %cst_22 {dimension_numbers = #tpu.dot_dimension_numbers<[1], [0], [0], [1], [0, 0, 1, 1], [], []>} : vector<8x16xbf16>, vector<16x8xbf16>, vector<8x8xf32> -> vector<8x8xf32>
    %40 = arith.truncf %39 : vector<8x8xf32> to vector<8x8xbf16>
    %c0_23 = arith.constant 0 : index
    %c0_24 = arith.constant 0 : index
    %c0_25 = arith.constant 0 : index
    %41 = vector.load %arg10[%c0_23, %c0_24, %c0_25] : memref<4x8x32xbf16, #tpu.memory_space<vmem>>, vector<1x8x32xbf16>
    %42 = vector.shape_cast %41 : vector<1x8x32xbf16> to vector<8x32xbf16>
    %cst_26 = arith.constant dense<0.000000e+00> : vector<8x32xf32>
    %43 = tpu.matmul %40, %42, %cst_26 {dimension_numbers = #tpu.dot_dimension_numbers<[1], [0], [0], [1], [0, 0, 1, 1], [], []>} : vector<8x8xbf16>, vector<8x32xbf16>, vector<8x32xf32> -> vector<8x32xf32>
    %44 = arith.addf %13, %43 : vector<8x32xf32>
    %c1 = arith.constant 1 : index
    %c0_27 = arith.constant 0 : index
    %c0_28 = arith.constant 0 : index
    %45 = vector.load %arg4[%c1, %c0_27, %c0_28] : memref<4x32x8xbf16, #tpu.memory_space<vmem>>, vector<1x32x8xbf16>
    %46 = vector.shape_cast %45 : vector<1x32x8xbf16> to vector<32x8xbf16>
    %cst_29 = arith.constant dense<0.000000e+00> : vector<8x8xf32>
    %47 = tpu.matmul %8, %46, %cst_29 {dimension_numbers = #tpu.dot_dimension_numbers<[1], [0], [0], [1], [0, 0, 1, 1], [], []>} : vector<8x32xbf16>, vector<32x8xbf16>, vector<8x8xf32> -> vector<8x8xf32>
    %c1_30 = arith.constant 1 : index
    %c0_31 = arith.constant 0 : index
    %c0_32 = arith.constant 0 : index
    %48 = vector.load %arg5[%c1_30, %c0_31, %c0_32] : memref<4x1x8xf32, #tpu.memory_space<vmem>>, vector<1x1x8xf32>
    %49 = vector.shape_cast %48 : vector<1x1x8xf32> to vector<1x8xf32>
    %50 = vector.broadcast %49 : vector<1x8xf32> to vector<8x8xf32>
    %51 = arith.addf %47, %50 : vector<8x8xf32>
    %52 = arith.truncf %51 : vector<8x8xf32> to vector<8x8xbf16>
    %c1_33 = arith.constant 1 : index
    %c0_34 = arith.constant 0 : index
    %c0_35 = arith.constant 0 : index
    %53 = vector.load %arg15[%c1_33, %c0_34, %c0_35] : memref<4x16x8xbf16, #tpu.memory_space<vmem>>, vector<1x16x8xbf16>
    %54 = vector.shape_cast %53 : vector<1x16x8xbf16> to vector<16x8xbf16>
    %cst_36 = arith.constant dense<0.000000e+00> : vector<8x16xf32>
    %55 = tpu.matmul %52, %54, %cst_36 {dimension_numbers = #tpu.dot_dimension_numbers<[1], [1], [0], [0], [0, 0, 1, 0], [], []>} : vector<8x8xbf16>, vector<16x8xbf16>, vector<8x16xf32> -> vector<8x16xf32>
    %56 = arith.addf %55, %12 : vector<8x16xf32>
    %cst_37 = arith.constant dense<0xFF800000> : vector<8xf32>
    %57 = vector.multi_reduction <maximumf>, %56, %cst_37 [1] : vector<8x16xf32> to vector<8xf32>
    %58 = vector.shape_cast %57 : vector<8xf32> to vector<8x1xf32>
    %59 = vector.broadcast %58 : vector<8x1xf32> to vector<8x16xf32>
    %60 = arith.subf %56, %59 : vector<8x16xf32>
    %61 = math.exp %60 : vector<8x16xf32>
    %cst_38 = arith.constant dense<0.000000e+00> : vector<8xf32>
    %62 = vector.multi_reduction <add>, %61, %cst_38 [1] : vector<8x16xf32> to vector<8xf32>
    %63 = vector.shape_cast %62 : vector<8xf32> to vector<8x1xf32>
    %64 = tpu.reciprocal %63 {approx = true} : vector<8x1xf32> -> vector<8x1xf32>
    %65 = vector.broadcast %64 : vector<8x1xf32> to vector<8x16xf32>
    %66 = arith.mulf %61, %65 : vector<8x16xf32>
    %67 = arith.truncf %66 : vector<8x16xf32> to vector<8x16xbf16>
    %c1_39 = arith.constant 1 : index
    %c0_40 = arith.constant 0 : index
    %c0_41 = arith.constant 0 : index
    %68 = vector.load %arg16[%c1_39, %c0_40, %c0_41] : memref<4x16x8xbf16, #tpu.memory_space<vmem>>, vector<1x16x8xbf16>
    %69 = vector.shape_cast %68 : vector<1x16x8xbf16> to vector<16x8xbf16>
    %cst_42 = arith.constant dense<0.000000e+00> : vector<8x8xf32>
    %70 = tpu.matmul %67, %69, %cst_42 {dimension_numbers = #tpu.dot_dimension_numbers<[1], [0], [0], [1], [0, 0, 1, 1], [], []>} : vector<8x16xbf16>, vector<16x8xbf16>, vector<8x8xf32> -> vector<8x8xf32>
    %71 = arith.truncf %70 : vector<8x8xf32> to vector<8x8xbf16>
    %c1_43 = arith.constant 1 : index
    %c0_44 = arith.constant 0 : index
    %c0_45 = arith.constant 0 : index
    %72 = vector.load %arg10[%c1_43, %c0_44, %c0_45] : memref<4x8x32xbf16, #tpu.memory_space<vmem>>, vector<1x8x32xbf16>
    %73 = vector.shape_cast %72 : vector<1x8x32xbf16> to vector<8x32xbf16>
    %cst_46 = arith.constant dense<0.000000e+00> : vector<8x32xf32>
    %74 = tpu.matmul %71, %73, %cst_46 {dimension_numbers = #tpu.dot_dimension_numbers<[1], [0], [0], [1], [0, 0, 1, 1], [], []>} : vector<8x8xbf16>, vector<8x32xbf16>, vector<8x32xf32> -> vector<8x32xf32>
    %75 = arith.addf %44, %74 : vector<8x32xf32>
    %c2 = arith.constant 2 : index
    %c0_47 = arith.constant 0 : index
    %c0_48 = arith.constant 0 : index
    %76 = vector.load %arg4[%c2, %c0_47, %c0_48] : memref<4x32x8xbf16, #tpu.memory_space<vmem>>, vector<1x32x8xbf16>
    %77 = vector.shape_cast %76 : vector<1x32x8xbf16> to vector<32x8xbf16>
    %cst_49 = arith.constant dense<0.000000e+00> : vector<8x8xf32>
    %78 = tpu.matmul %8, %77, %cst_49 {dimension_numbers = #tpu.dot_dimension_numbers<[1], [0], [0], [1], [0, 0, 1, 1], [], []>} : vector<8x32xbf16>, vector<32x8xbf16>, vector<8x8xf32> -> vector<8x8xf32>
    %c2_50 = arith.constant 2 : index
    %c0_51 = arith.constant 0 : index
    %c0_52 = arith.constant 0 : index
    %79 = vector.load %arg5[%c2_50, %c0_51, %c0_52] : memref<4x1x8xf32, #tpu.memory_space<vmem>>, vector<1x1x8xf32>
    %80 = vector.shape_cast %79 : vector<1x1x8xf32> to vector<1x8xf32>
    %81 = vector.broadcast %80 : vector<1x8xf32> to vector<8x8xf32>
    %82 = arith.addf %78, %81 : vector<8x8xf32>
    %83 = arith.truncf %82 : vector<8x8xf32> to vector<8x8xbf16>
    %c2_53 = arith.constant 2 : index
    %c0_54 = arith.constant 0 : index
    %c0_55 = arith.constant 0 : index
    %84 = vector.load %arg15[%c2_53, %c0_54, %c0_55] : memref<4x16x8xbf16, #tpu.memory_space<vmem>>, vector<1x16x8xbf16>
    %85 = vector.shape_cast %84 : vector<1x16x8xbf16> to vector<16x8xbf16>
    %cst_56 = arith.constant dense<0.000000e+00> : vector<8x16xf32>
    %86 = tpu.matmul %83, %85, %cst_56 {dimension_numbers = #tpu.dot_dimension_numbers<[1], [1], [0], [0], [0, 0, 1, 0], [], []>} : vector<8x8xbf16>, vector<16x8xbf16>, vector<8x16xf32> -> vector<8x16xf32>
    %87 = arith.addf %86, %12 : vector<8x16xf32>
    %cst_57 = arith.constant dense<0xFF800000> : vector<8xf32>
    %88 = vector.multi_reduction <maximumf>, %87, %cst_57 [1] : vector<8x16xf32> to vector<8xf32>
    %89 = vector.shape_cast %88 : vector<8xf32> to vector<8x1xf32>
    %90 = vector.broadcast %89 : vector<8x1xf32> to vector<8x16xf32>
    %91 = arith.subf %87, %90 : vector<8x16xf32>
    %92 = math.exp %91 : vector<8x16xf32>
    %cst_58 = arith.constant dense<0.000000e+00> : vector<8xf32>
    %93 = vector.multi_reduction <add>, %92, %cst_58 [1] : vector<8x16xf32> to vector<8xf32>
    %94 = vector.shape_cast %93 : vector<8xf32> to vector<8x1xf32>
    %95 = tpu.reciprocal %94 {approx = true} : vector<8x1xf32> -> vector<8x1xf32>
    %96 = vector.broadcast %95 : vector<8x1xf32> to vector<8x16xf32>
    %97 = arith.mulf %92, %96 : vector<8x16xf32>
    %98 = arith.truncf %97 : vector<8x16xf32> to vector<8x16xbf16>
    %c2_59 = arith.constant 2 : index
    %c0_60 = arith.constant 0 : index
    %c0_61 = arith.constant 0 : index
    %99 = vector.load %arg16[%c2_59, %c0_60, %c0_61] : memref<4x16x8xbf16, #tpu.memory_space<vmem>>, vector<1x16x8xbf16>
    %100 = vector.shape_cast %99 : vector<1x16x8xbf16> to vector<16x8xbf16>
    %cst_62 = arith.constant dense<0.000000e+00> : vector<8x8xf32>
    %101 = tpu.matmul %98, %100, %cst_62 {dimension_numbers = #tpu.dot_dimension_numbers<[1], [0], [0], [1], [0, 0, 1, 1], [], []>} : vector<8x16xbf16>, vector<16x8xbf16>, vector<8x8xf32> -> vector<8x8xf32>
    %102 = arith.truncf %101 : vector<8x8xf32> to vector<8x8xbf16>
    %c2_63 = arith.constant 2 : index
    %c0_64 = arith.constant 0 : index
    %c0_65 = arith.constant 0 : index
    %103 = vector.load %arg10[%c2_63, %c0_64, %c0_65] : memref<4x8x32xbf16, #tpu.memory_space<vmem>>, vector<1x8x32xbf16>
    %104 = vector.shape_cast %103 : vector<1x8x32xbf16> to vector<8x32xbf16>
    %cst_66 = arith.constant dense<0.000000e+00> : vector<8x32xf32>
    %105 = tpu.matmul %102, %104, %cst_66 {dimension_numbers = #tpu.dot_dimension_numbers<[1], [0], [0], [1], [0, 0, 1, 1], [], []>} : vector<8x8xbf16>, vector<8x32xbf16>, vector<8x32xf32> -> vector<8x32xf32>
    %106 = arith.addf %75, %105 : vector<8x32xf32>
    %c3 = arith.constant 3 : index
    %c0_67 = arith.constant 0 : index
    %c0_68 = arith.constant 0 : index
    %107 = vector.load %arg4[%c3, %c0_67, %c0_68] : memref<4x32x8xbf16, #tpu.memory_space<vmem>>, vector<1x32x8xbf16>
    %108 = vector.shape_cast %107 : vector<1x32x8xbf16> to vector<32x8xbf16>
    %cst_69 = arith.constant dense<0.000000e+00> : vector<8x8xf32>
    %109 = tpu.matmul %8, %108, %cst_69 {dimension_numbers = #tpu.dot_dimension_numbers<[1], [0], [0], [1], [0, 0, 1, 1], [], []>} : vector<8x32xbf16>, vector<32x8xbf16>, vector<8x8xf32> -> vector<8x8xf32>
    %c3_70 = arith.constant 3 : index
    %c0_71 = arith.constant 0 : index
    %c0_72 = arith.constant 0 : index
    %110 = vector.load %arg5[%c3_70, %c0_71, %c0_72] : memref<4x1x8xf32, #tpu.memory_space<vmem>>, vector<1x1x8xf32>
    %111 = vector.shape_cast %110 : vector<1x1x8xf32> to vector<1x8xf32>
    %112 = vector.broadcast %111 : vector<1x8xf32> to vector<8x8xf32>
    %113 = arith.addf %109, %112 : vector<8x8xf32>
    %114 = arith.truncf %113 : vector<8x8xf32> to vector<8x8xbf16>
    %c3_73 = arith.constant 3 : index
    %c0_74 = arith.constant 0 : index
    %c0_75 = arith.constant 0 : index
    %115 = vector.load %arg15[%c3_73, %c0_74, %c0_75] : memref<4x16x8xbf16, #tpu.memory_space<vmem>>, vector<1x16x8xbf16>
    %116 = vector.shape_cast %115 : vector<1x16x8xbf16> to vector<16x8xbf16>
    %cst_76 = arith.constant dense<0.000000e+00> : vector<8x16xf32>
    %117 = tpu.matmul %114, %116, %cst_76 {dimension_numbers = #tpu.dot_dimension_numbers<[1], [1], [0], [0], [0, 0, 1, 0], [], []>} : vector<8x8xbf16>, vector<16x8xbf16>, vector<8x16xf32> -> vector<8x16xf32>
    %118 = arith.addf %117, %12 : vector<8x16xf32>
    %cst_77 = arith.constant dense<0xFF800000> : vector<8xf32>
    %119 = vector.multi_reduction <maximumf>, %118, %cst_77 [1] : vector<8x16xf32> to vector<8xf32>
    %120 = vector.shape_cast %119 : vector<8xf32> to vector<8x1xf32>
    %121 = vector.broadcast %120 : vector<8x1xf32> to vector<8x16xf32>
    %122 = arith.subf %118, %121 : vector<8x16xf32>
    %123 = math.exp %122 : vector<8x16xf32>
    %cst_78 = arith.constant dense<0.000000e+00> : vector<8xf32>
    %124 = vector.multi_reduction <add>, %123, %cst_78 [1] : vector<8x16xf32> to vector<8xf32>
    %125 = vector.shape_cast %124 : vector<8xf32> to vector<8x1xf32>
    %126 = tpu.reciprocal %125 {approx = true} : vector<8x1xf32> -> vector<8x1xf32>
    %127 = vector.broadcast %126 : vector<8x1xf32> to vector<8x16xf32>
    %128 = arith.mulf %123, %127 : vector<8x16xf32>
    %129 = arith.truncf %128 : vector<8x16xf32> to vector<8x16xbf16>
    %c3_79 = arith.constant 3 : index
    %c0_80 = arith.constant 0 : index
    %c0_81 = arith.constant 0 : index
    %130 = vector.load %arg16[%c3_79, %c0_80, %c0_81] : memref<4x16x8xbf16, #tpu.memory_space<vmem>>, vector<1x16x8xbf16>
    %131 = vector.shape_cast %130 : vector<1x16x8xbf16> to vector<16x8xbf16>
    %cst_82 = arith.constant dense<0.000000e+00> : vector<8x8xf32>
    %132 = tpu.matmul %129, %131, %cst_82 {dimension_numbers = #tpu.dot_dimension_numbers<[1], [0], [0], [1], [0, 0, 1, 1], [], []>} : vector<8x16xbf16>, vector<16x8xbf16>, vector<8x8xf32> -> vector<8x8xf32>
    %133 = arith.truncf %132 : vector<8x8xf32> to vector<8x8xbf16>
    %c3_83 = arith.constant 3 : index
    %c0_84 = arith.constant 0 : index
    %c0_85 = arith.constant 0 : index
    %134 = vector.load %arg10[%c3_83, %c0_84, %c0_85] : memref<4x8x32xbf16, #tpu.memory_space<vmem>>, vector<1x8x32xbf16>
    %135 = vector.shape_cast %134 : vector<1x8x32xbf16> to vector<8x32xbf16>
    %cst_86 = arith.constant dense<0.000000e+00> : vector<8x32xf32>
    %136 = tpu.matmul %133, %135, %cst_86 {dimension_numbers = #tpu.dot_dimension_numbers<[1], [0], [0], [1], [0, 0, 1, 1], [], []>} : vector<8x8xbf16>, vector<8x32xbf16>, vector<8x32xf32> -> vector<8x32xf32>
    %137 = arith.addf %106, %136 : vector<8x32xf32>
    %c0_87 = arith.constant 0 : index
    %c0_88 = arith.constant 0 : index
    %138 = vector.load %arg11[%c0_87, %c0_88] : memref<1x32xf32, #tpu.memory_space<vmem>>, vector<1x32xf32>
    %139 = vector.broadcast %138 : vector<1x32xf32> to vector<8x32xf32>
    %140 = arith.addf %137, %139 : vector<8x32xf32>
    %141 = arith.addf %140, %7 : vector<8x32xf32>
    %cst_89 = arith.constant dense<0.000000e+00> : vector<8xf32>
    %142 = vector.multi_reduction <add>, %141, %cst_89 [1] : vector<8x32xf32> to vector<8xf32>
    %143 = vector.shape_cast %142 : vector<8xf32> to vector<8x1xf32>
    %cst_90 = arith.constant 3.200000e+01 : f32
    %144 = vector.broadcast %cst_90 : f32 to vector<8x1xf32>
    %145 = arith.divf %143, %144 : vector<8x1xf32>
    %146 = vector.broadcast %145 : vector<8x1xf32> to vector<8x32xf32>
    %147 = arith.subf %141, %146 : vector<8x32xf32>
    %148 = arith.mulf %147, %147 : vector<8x32xf32>
    %cst_91 = arith.constant dense<0.000000e+00> : vector<8xf32>
    %149 = vector.multi_reduction <add>, %148, %cst_91 [1] : vector<8x32xf32> to vector<8xf32>
    %150 = vector.shape_cast %149 : vector<8xf32> to vector<8x1xf32>
    %cst_92 = arith.constant 3.200000e+01 : f32
    %151 = vector.broadcast %cst_92 : f32 to vector<8x1xf32>
    %152 = arith.divf %150, %151 : vector<8x1xf32>
    %153 = vector.broadcast %145 : vector<8x1xf32> to vector<8x32xf32>
    %154 = arith.subf %141, %153 : vector<8x32xf32>
    %cst_93 = arith.constant 9.99999996E-13 : f32
    %155 = vector.broadcast %cst_93 : f32 to vector<8x1xf32>
    %156 = arith.addf %152, %155 : vector<8x1xf32>
    %157 = math.rsqrt %156 : vector<8x1xf32>
    %158 = vector.broadcast %157 : vector<8x1xf32> to vector<8x32xf32>
    %159 = arith.mulf %154, %158 : vector<8x32xf32>
    %c0_94 = arith.constant 0 : index
    %c0_95 = arith.constant 0 : index
    %160 = vector.load %arg12[%c0_94, %c0_95] : memref<1x32xf32, #tpu.memory_space<vmem>>, vector<1x32xf32>
    %161 = vector.broadcast %160 : vector<1x32xf32> to vector<8x32xf32>
    %162 = arith.mulf %159, %161 : vector<8x32xf32>
    %c0_96 = arith.constant 0 : index
    %c0_97 = arith.constant 0 : index
    %163 = vector.load %arg13[%c0_96, %c0_97] : memref<1x32xf32, #tpu.memory_space<vmem>>, vector<1x32xf32>
    %164 = vector.broadcast %163 : vector<1x32xf32> to vector<8x32xf32>
    %165 = arith.addf %162, %164 : vector<8x32xf32>
    %c0_98 = arith.constant 0 : index
    %c0_99 = arith.constant 0 : index
    %c0_100 = arith.constant 0 : index
    %166 = vector.load %arg14[%c0_98, %c0_99, %c0_100] : memref<1x8x32xf32, #tpu.memory_space<vmem>>, vector<1x8x32xf32>
    %167 = vector.shape_cast %166 : vector<1x8x32xf32> to vector<8x32xf32>
    %168 = vector.shape_cast %165 : vector<8x32xf32> to vector<1x8x32xf32>
    tpu.vector_store %arg14[%c0_98, %c0_99, %c0_100], %168 {strides = array<i32>} : memref<1x8x32xf32, #tpu.memory_space<vmem>>, vector<1x8x32xf32>,
    return
  }
  func.func @transform_0(%arg0: i32, %arg1: i32) -> (i32, i32, i32, i32) {
    %c0_i32 = arith.constant 0 : i32
    %c0_i32_0 = arith.constant 0 : i32
    %c0_i32_1 = arith.constant 0 : i32
    %c0_i32_2 = arith.constant 0 : i32
    return %arg0, %c0_i32, %c0_i32_0, %c0_i32_1 : i32, i32, i32, i32
  }
  func.func @transform_1(%arg0: i32, %arg1: i32) -> (i32, i32, i32) {
    %c0_i32 = arith.constant 0 : i32
    %c0_i32_0 = arith.constant 0 : i32
    %c0_i32_1 = arith.constant 0 : i32
    return %arg0, %c0_i32, %c0_i32_0 : i32, i32, i32
  }
  func.func @transform_2(%arg0: i32, %arg1: i32) -> (i32, i32, i32) {
    %c0_i32 = arith.constant 0 : i32
    %c0_i32_0 = arith.constant 0 : i32
    %c0_i32_1 = arith.constant 0 : i32
    %c0_i32_2 = arith.constant 0 : i32
    return %c0_i32, %c0_i32_0, %c0_i32_1 : i32, i32, i32
  }
  func.func @transform_3(%arg0: i32, %arg1: i32) -> (i32, i32, i32) {
    %c0_i32 = arith.constant 0 : i32
    %c0_i32_0 = arith.constant 0 : i32
    %c0_i32_1 = arith.constant 0 : i32
    %c0_i32_2 = arith.constant 0 : i32
    return %c0_i32, %c0_i32_0, %c0_i32_1 : i32, i32, i32
  }
  func.func @transform_4(%arg0: i32, %arg1: i32) -> (i32, i32, i32) {
    %c0_i32 = arith.constant 0 : i32
    %c0_i32_0 = arith.constant 0 : i32
    %c0_i32_1 = arith.constant 0 : i32
    %c0_i32_2 = arith.constant 0 : i32
    return %c0_i32, %c0_i32_0, %c0_i32_1 : i32, i32, i32
  }
  func.func @transform_5(%arg0: i32, %arg1: i32) -> (i32, i32, i32) {
    %c0_i32 = arith.constant 0 : i32
    %c0_i32_0 = arith.constant 0 : i32
    %c0_i32_1 = arith.constant 0 : i32
    %c0_i32_2 = arith.constant 0 : i32
    return %c0_i32, %c0_i32_0, %c0_i32_1 : i32, i32, i32
  }
  func.func @transform_6(%arg0: i32, %arg1: i32) -> (i32, i32, i32) {
    %c0_i32 = arith.constant 0 : i32
    %c0_i32_0 = arith.constant 0 : i32
    %c0_i32_1 = arith.constant 0 : i32
    %c0_i32_2 = arith.constant 0 : i32
    return %c0_i32, %c0_i32_0, %c0_i32_1 : i32, i32, i32
  }
  func.func @transform_7(%arg0: i32, %arg1: i32) -> (i32, i32, i32) {
    %c0_i32 = arith.constant 0 : i32
    %c0_i32_0 = arith.constant 0 : i32
    %c0_i32_1 = arith.constant 0 : i32
    %c0_i32_2 = arith.constant 0 : i32
    return %c0_i32, %c0_i32_0, %c0_i32_1 : i32, i32, i32
  }
  func.func @transform_8(%arg0: i32, %arg1: i32) -> (i32, i32, i32) {
    %c0_i32 = arith.constant 0 : i32
    %c0_i32_0 = arith.constant 0 : i32
    %c0_i32_1 = arith.constant 0 : i32
    %c0_i32_2 = arith.constant 0 : i32
    return %c0_i32, %c0_i32_0, %c0_i32_1 : i32, i32, i32
  }
  func.func @transform_9(%arg0: i32, %arg1: i32) -> (i32, i32) {
    %c0_i32 = arith.constant 0 : i32
    %c0_i32_0 = arith.constant 0 : i32
    %c0_i32_1 = arith.constant 0 : i32
    return %c0_i32, %c0_i32_0 : i32, i32
  }
  func.func @transform_10(%arg0: i32, %arg1: i32) -> (i32, i32) {
    %c0_i32 = arith.constant 0 : i32
    %c0_i32_0 = arith.constant 0 : i32
    %c0_i32_1 = arith.constant 0 : i32
    return %c0_i32, %c0_i32_0 : i32, i32
  }
  func.func @transform_11(%arg0: i32, %arg1: i32) -> (i32, i32) {
    %c0_i32 = arith.constant 0 : i32
    %c0_i32_0 = arith.constant 0 : i32
    %c0_i32_1 = arith.constant 0 : i32
    return %c0_i32, %c0_i32_0 : i32, i32
  }
  func.func @transform_12(%arg0: i32, %arg1: i32) -> (i32, i32, i32) {
    %c0_i32 = arith.constant 0 : i32
    %c0_i32_0 = arith.constant 0 : i32
    return %arg0, %arg1, %c0_i32 : i32, i32, i32
  }
}

</mosaic_0001>

<bundles_post_ra>
// kernel: tpu_custom_call.1
= control target key start
LH: loop header
LB: loop body
LE: loop exit
PB: predicated region body
PF: predicated region fallthrough
CT: control target
= control target key end

     0   :  { %17 = vsyncpa [#allocation5], 0  ;;  %s2298_s0 = inlined_call_operand.vmem [shape: f32[2,1,1,16], index: 0, kind: input, shape index: {}]   ;;  %s2299_s1 = inlined_call_operand.vmem [shape: f32[2,16,32], index: 1, kind: input, shape index: {}]   ;;  %s2300_s2 = inlined_call_operand.vmem [shape: bf16[4,32,8], index: 2, kind: input, shape index: {}]   ;;  %s2301_s3 = inlined_call_operand.vmem [shape: f32[4,1,8], index: 3, kind: input, shape index: {}]   ;;  %s2302_s4 = inlined_call_operand.vmem [shape: bf16[4,32,8], index: 4, kind: input, shape index: {}]   ;;  %s2303_s5 = inlined_call_operand.vmem [shape: f32[4,1,8], index: 5, kind: input, shape index: {}]   ;;  %s2304_s6 = inlined_call_operand.vmem [shape: bf16[4,32,8], index: 6, kind: input, shape index: {}]   ;;  %s2305_s7 = inlined_call_operand.vmem [shape: f32[4,1,8], index: 7, kind: input, shape index: {}]   ;;  %s2306_s8 = inlined_call_operand.vmem [shape: bf16[4,8,32], index: 8, kind: input, shape index: {}]   ;;  %s2307_s9 = inlined_call_operand.vmem [shape: f32[1,32], index: 9, kind: input, shape index: {}]   ;;  %s2308_s10 = inlined_call_operand.vmem [shape: f32[1,32], index: 10, kind: input, shape index: {}]   ;;  %s2309_s11 = inlined_call_operand.vmem [shape: f32[1,32], index: 11, kind: input, shape index: {}]   ;;  %s2310_s12 = inlined_call_operand.hbm [shape: f32[2,16,32], index: 12, kind: output, shape index: {}]  }
   0x1   :  { %19 = vsyncpa [#allocation5 + $0x1], 0  ;;  %s1940_s21 = smov 0   ;;  %s1942_s22 = smov 0  }
   0x2   :  { %s1944_s23 = smov 0   ;;  %s1946_s24 = smov 0  }
   0x3   :  { %s1948_s25 = smov 0   ;;  %s1950_s26 = smov 0  }
   0x4   :  { %s1952_s27 = smov 0   ;;  %s1954_s28 = smov 0  }
   0x5 LB: > { %2319 = sst [smem:[#allocation7_spill]] %s1844_s21  ;;  %s1422_s29 = sadd.s32 4294967295, %s1872_s28   ;;  %s1872_s28 = sphi %s1954_s28, %s25_s28   ;;  %s1868_s27 = sphi %s1952_s27, %s2340_s27   ;;  %s1864_s26 = sphi %s1950_s26, %s2343_s26   ;;  %s1860_s25 = sphi %s1948_s25, %s2338_s25   ;;  %s1856_s24 = sphi %s1946_s24, %s2337_s24   ;;  %s1852_s23 = sphi %s1944_s23, %s2336_s23   ;;  %s1848_s22 = sphi %s1942_s22, %s2342_s22   ;;  %s1844_s21 = sphi %s1940_s21, %s2341_s21  }
   0x6   : > { %2320 = sst [smem:[#allocation8_spill]] %s1852_s23  ;;  %s1423_s30 = sadd.s32 4294967294, %s1872_s28  }
   0x7   : > { %2321 = sst [smem:[#allocation9_spill]] %s1864_s26  ;;  %s34_s13 = sadd.s32 1, %s1864_s26 }
   0x8   : > { %2322 = sst [smem:[#allocation10_spill]] %s1868_s27  ;;  %p35_p0 = scmp.ge.s32.totalorder %s34_s13, 2 }
   0x9   : > { %s37_s14 = sadd.s32 1, %s1868_s27  ;;  %p318_p1 = scmp.ne.s32.totalorder %s1852_s23, %s1848_s22 }
   0xa   : > { %p319_p2 = scmp.eq.s32.totalorder %s1422_s29, 3  ;;  %s2345_s13 = smov (%p35_p0, %s34_s13), 0 }
   0xb   : > { %2323 = sst [smem:[#allocation11_spill]] %s2345_s13  ;;  %s2347_s14 = smov (!%p35_p0, %s37_s14), %s1868_s27 }
   0xc   : > { %s304_s15 = ssub.s32 %s1864_s26, %s2345_s13  ;;  %p1991_p3 = por %p319_p2, %p318_p1 }
   0xd   : > { %p39_p4 = scmp.ge.s32.totalorder %s2347_s14, 2  ;;  %p324_p5 = scmp.ne.s32.totalorder %s1848_s22, %s1844_s21 }
   0xe   : > { %p325_p6 = scmp.eq.s32.totalorder %s1423_s30, 3  ;;  %p1426_p7 = scmp.ge.s32.totalorder %s1872_s28, 1 }
   0xf   : > { %s2349_s14 = smov (%p39_p4, %s2347_s14), 0  ;;  %p387_p9 = scmp.lt.s32.totalorder %s1872_s28, 5 }
  0x10   : > { %2325 = sst [smem:[#allocation12_spill]] %s2349_s14  ;;  %p2000_p8 = por %p325_p6, %p324_p5 }
  0x11   : > { %s303_s18 = ssub.s32 %s1868_s27, %s2349_s14  ;;  %s308_s19 = sadd.s32 1, %s1852_s23 }
  0x12   : > { %s2326_s17 = scalar_select %p2000_p8, 1, 0 }
  0x13   : > { %s305_s20 = sor.u32 %s304_s15, %s303_s18  ;;  %p388_p10 = pnand %p1426_p7, %p387_p9 }
  0x14   : > { %2327 = sst [smem:[#allocation13_spill]] %s2326_s17  ;;  %p306_p11 = scmp.eq.s32.totalorder %s305_s20, 0 }
  0x15   : > { %391 = sbr.rel (%p388_p10) target bundleno = 2085 (0x825), region = 68  ;;  %s2316_s30 = sand.u32 (!%p388_p10), 1, %s1848_s22  }
  0x16   : > { %s2009_s29 = scalar_select %p306_p11, %s1852_s23, %s308_s19  }
  0x17   : > { %p432_p12 = scmp.lt.s32.totalorder (!%p388_p10), %s1860_s25, 1  ;;  %s2015_s13 = sshll.u32 (!%p388_p10), %s2316_s30, 3 }
  0x18   : > { %2328 = sst [smem:[#allocation14_spill]] %s2009_s29  ;;  %p1430_p13 = scmp.ne.s32.totalorder (!%p388_p10), %s1856_s24, 0 }
  0x1a   : > { %s2018_s26 = scalar_select %p432_p12, %s1860_s25, 1 }
  0x1b   : > { %444 = sbr.rel (%p1430_p13) target bundleno = 204 (0xcc), region = 72 }
  0x1c   : > { %s1637_s19 = sshll.u32 %s2018_s26, 4 }
  0x1d   : > { %s2028_s29 = scalar_lea.vmem %s2299_s1, %s1637_s19 }
  0x20   : > { %v1639_v0 = vld [vmem:[%s2302_s4 + $0x8] sm:$0xff]  ;;  %v1643_v2 = vld [vmem:[%s2302_s4 + $0x18] sm:$0xff]  ;;  %v1638_v4 = vld [vmem:[%s2302_s4] sm:$0xff]  ;;  %vm468_vm0 = vcmask 261120   ;;  %vm522_vm1 = vcmask 60416  }
  0x21   : > { %v1641_v1 = vld [vmem:[%s2304_s6 + $0x8] sm:$0xff]  ;;  %v1645_v3 = vld [vmem:[%s2304_s6 + $0x18] sm:$0xff]  ;;  %478 = vmatpush.bf16.msra.mxu0 %v1639_v0  ;;  %v1640_v5 = vld [vmem:[%s2304_s6] sm:$0xff]  ;;  %557 = vmatpush.bf16.msra.mxu2 %v1643_v2 }
  0x22   : > { %512 = vmatpush.bf16.msra.mxu1 %v1641_v1  ;;  %v445_v6 = vld [vmem:[%s2028_s29] sm:$0xff]  ;;  %593 = vmatpush.bf16.msra.mxu3 %v1645_v3  ;;  %v1642_v7 = vld [vmem:[%s2302_s4 + $0x10] sm:$0xff]  ;;  %v446_v9 = vld [vmem:[%s2028_s29 + $0x8] sm:$0xff] }
  0x23   : > { %v1644_v8 = vld [vmem:[%s2304_s6 + $0x10] sm:$0xff]  ;;  %v1651_v10 = vld [vmem:[%s2302_s4 + $0x38] sm:$0xff]  ;;  %v447_v12 = vpack.c.bf16 %v446_v9, %v445_v6  ;;  %v1647_v13 = vld [vmem:[%s2302_s4 + $0x28] sm:$0xff] }
  0x24   : > { %v1653_v11 = vld [vmem:[%s2304_s6 + $0x38] sm:$0xff]  ;;  %v1649_v14 = vld [vmem:[%s2304_s6 + $0x28] sm:$0xff]  ;;  %v1650_v15 = vld [vmem:[%s2302_s4 + $0x30] sm:$0xff] }
  0x25   : > { %479 = vmatpush.bf16.msra.mxu0 %v1638_v4  ;;  %v1652_v16 = vld [vmem:[%s2304_s6 + $0x30] sm:$0xff]  ;;  %558 = vmatpush.bf16.msra.mxu2 %v1642_v7  ;;  %v1646_v17 = vld [vmem:[%s2302_s4 + $0x20] sm:$0xff] }
  0x26   : > { %513 = vmatpush.bf16.msra.mxu1 %v1640_v5  ;;  %594 = vmatpush.bf16.msra.mxu3 %v1644_v8  ;;  %v1648_v18 = vld [vmem:[%s2304_s6 + $0x20] sm:$0xff] }
  0x27   : > { %v1742_v19 = vld [vmem:[%s2303_s5] ss:$0 sm:$0xff]  ;;  %v1744_v27 = vld [vmem:[%s2303_s5 + $0x1] ss:$0 sm:$0xff]  ;;  %v1746_v41 = vld [vmem:[%s2303_s5 + $0x2] ss:$0 sm:$0xff] }
  0x28   : > { %1439 = vmatmul.msk.bf16.vlgmr.msra.gmra.mxu0 %vm468_vm0, %v447_v12  ;;  %1462 = vmatmul.msk.bf16.vlgmr.msra.gmra.mxu2 %vm468_vm0, %v447_v12  ;;  %v1743_v20 = vld [vmem:[%s2305_s7] ss:$0 sm:$0xff]  ;;  %v1745_v28 = vld [vmem:[%s2305_s7 + $0x1] ss:$0 sm:$0xff]  ;;  %v1747_v42 = vld [vmem:[%s2305_s7 + $0x2] ss:$0 sm:$0xff] }
  0x29   : > { %721 = vmatpush.bf16.msrb.mxu2 %v1651_v10  ;;  %1448 = vmatmul.msk.bf16.vlgmr.msra.gmra.mxu1 %vm468_vm0, %v447_v12  ;;  %v1748_v55 = vld [vmem:[%s2303_s5 + $0x3] ss:$0 sm:$0xff] }
  0x2a   : > { %757 = vmatpush.bf16.msrb.mxu3 %v1653_v11  ;;  %639 = vmatpush.bf16.msrb.mxu0 %v1647_v13  ;;  %v1749_v56 = vld [vmem:[%s2305_s7 + $0x3] ss:$0 sm:$0xff] }
  0x2b   : > { %1476 = vmatmul.msk.bf16.vlgmr.msra.gmra.mxu3 %vm468_vm0, %v447_v12  ;;  %675 = vmatpush.bf16.msrb.mxu1 %v1649_v14 }
  0x2d   : > { %722 = vmatpush.bf16.msrb.mxu2 %v1650_v15 }
  0x2e   : > { %758 = vmatpush.bf16.msrb.mxu3 %v1652_v16  ;;  %640 = vmatpush.bf16.msrb.mxu0 %v1646_v17 }
  0x2f   : > { %676 = vmatpush.bf16.msrb.mxu1 %v1648_v18 }
  0x38   : > { %1490 = vmatmul.msk.bf16.vlgmr.msrb.gmra.mxu0 %vm468_vm0, %v447_v12  ;;  %1518 = vmatmul.msk.bf16.vlgmr.msrb.gmra.mxu2 %vm468_vm0, %v447_v12 }
  0x39   : > { %1504 = vmatmul.msk.bf16.vlgmr.msrb.gmra.mxu1 %vm468_vm0, %v447_v12 }
  0x3b   : > { %1532 = vmatmul.msk.bf16.vlgmr.msrb.gmra.mxu3 %vm468_vm0, %v447_v12 }
  0xa5   : > { %v481_v21 = vpop.f32.mrf.mxu0 }
  0xa6   : > { %v515_v22 = vpop.f32.mrf.mxu1  ;;  %v482_v23 = vadd.f32 %v1742_v19, %v481_v21 }
  0xa7   : > { %v516_v24 = vadd.f32 %v1743_v20, %v515_v22 }
  0xa8   : > { %v520_v25 = vpack.c.bf16 %v482_v23, %v482_v23 }
  0xa9   : > { %v525_v26 = vpack.c.bf16 %v516_v24, %v516_v24 }
  0xaa   : > { %523 = vst.msk [vmem:[#allocation2] sm:$0xf] %vm522_vm1, %v520_v25 }
  0xab   : > { %527 = vst.msk [vmem:[#allocation3] sm:$0xf] %vm522_vm1, %v525_v26  ;;  %v560_v29 = vpop.f32.mrf.mxu2 }
  0xac   : > { %v561_v31 = vadd.f32 %v1744_v27, %v560_v29 }
  0xad   : > { %v483_v33 = vpop.f32.mrf.mxu0 }
  0xae   : > { %v596_v30 = vpop.f32.mrf.mxu3  ;;  %v517_v34 = vpop.f32.mrf.mxu1  ;;  %v484_v35 = vadd.f32 %v1742_v19, %v483_v33  ;;  %v601_v37 = vpack.c.bf16 %v561_v31, %v561_v31 }
  0xaf   : > { %v597_v32 = vadd.f32 %v1745_v28, %v596_v30  ;;  %v518_v36 = vadd.f32 %v1743_v20, %v517_v34 }
  0xb0   : > { %v521_v39 = vpack.c.bf16 %v484_v35, %v484_v35  ;;  %604 = vst.msk [vmem:[#allocation2 + $0x8] sm:$0xf] %vm522_vm1, %v601_v37 }
  0xb1   : > { %v606_v38 = vpack.c.bf16 %v597_v32, %v597_v32  ;;  %v526_v40 = vpack.c.bf16 %v518_v36, %v518_v36 }
  0xb2   : > { %524 = vst.msk [vmem:[#allocation2 + $0x4] sm:$0xf] %vm522_vm1, %v521_v39 }
  0xb3   : > { %609 = vst.msk [vmem:[#allocation3 + $0x8] sm:$0xf] %vm522_vm1, %v606_v38  ;;  %v562_v43 = vpop.f32.mrf.mxu2 }
  0xb4   : > { %528 = vst.msk [vmem:[#allocation3 + $0x4] sm:$0xf] %vm522_vm1, %v526_v40  ;;  %v563_v45 = vadd.f32 %v1744_v27, %v562_v43 }
  0xb5   : > { %v642_v47 = vpop.f32.mrf.mxu0 }
  0xb6   : > { %v598_v44 = vpop.f32.mrf.mxu3  ;;  %v678_v48 = vpop.f32.mrf.mxu1  ;;  %v643_v49 = vadd.f32 %v1746_v41, %v642_v47  ;;  %v602_v51 = vpack.c.bf16 %v563_v45, %v563_v45 }
  0xb7   : > { %v599_v46 = vadd.f32 %v1745_v28, %v598_v44  ;;  %v679_v50 = vadd.f32 %v1747_v42, %v678_v48 }
  0xb8   : > { %v683_v53 = vpack.c.bf16 %v643_v49, %v643_v49  ;;  %605 = vst.msk [vmem:[#allocation2 + $0xc] sm:$0xf] %vm522_vm1, %v602_v51 }
  0xb9   : > { %v607_v52 = vpack.c.bf16 %v599_v46, %v599_v46  ;;  %v688_v54 = vpack.c.bf16 %v679_v50, %v679_v50 }
  0xba   : > { %686 = vst.msk [vmem:[#allocation2 + $0x10] sm:$0xf] %vm522_vm1, %v683_v53 }
  0xbb   : > { %610 = vst.msk [vmem:[#allocation3 + $0xc] sm:$0xf] %vm522_vm1, %v607_v52  ;;  %v724_v57 = vpop.f32.mrf.mxu2 }
  0xbc   : > { %691 = vst.msk [vmem:[#allocation3 + $0x10] sm:$0xf] %vm522_vm1, %v688_v54  ;;  %v725_v59 = vadd.f32 %v1748_v55, %v724_v57 }
  0xbd   : > { %v644_v61 = vpop.f32.mrf.mxu0 }
  0xbe   : > { %v760_v58 = vpop.f32.mrf.mxu3  ;;  %v680_v62 = vpop.f32.mrf.mxu1  ;;  %v645_v63 = vadd.f32 %v1746_v41, %v644_v61  ;;  %v765_v1 = vpack.c.bf16 %v725_v59, %v725_v59 }
  0xbf   : > { %v761_v60 = vadd.f32 %v1749_v56, %v760_v58  ;;  %v681_v0 = vadd.f32 %v1747_v42, %v680_v62 }
  0xc0   : > { %v684_v3 = vpack.c.bf16 %v645_v63, %v645_v63  ;;  %768 = vst.msk [vmem:[#allocation2 + $0x18] sm:$0xf] %vm522_vm1, %v765_v1 }
  0xc1   : > { %v770_v2 = vpack.c.bf16 %v761_v60, %v761_v60  ;;  %v689_v4 = vpack.c.bf16 %v681_v0, %v681_v0 }
  0xc2   : > { %687 = vst.msk [vmem:[#allocation2 + $0x14] sm:$0xf] %vm522_vm1, %v684_v3 }
  0xc3   : > { %773 = vst.msk [vmem:[#allocation3 + $0x18] sm:$0xf] %vm522_vm1, %v770_v2  ;;  %v726_v5 = vpop.f32.mrf.mxu2 }
  0xc4   : > { %692 = vst.msk [vmem:[#allocation3 + $0x14] sm:$0xf] %vm522_vm1, %v689_v4  ;;  %v727_v7 = vadd.f32 %v1748_v55, %v726_v5 }
  0xc6   : > { %v762_v6 = vpop.f32.mrf.mxu3  ;;  %v766_v9 = vpack.c.bf16 %v727_v7, %v727_v7 }
  0xc7   : > { %v763_v8 = vadd.f32 %v1749_v56, %v762_v6 }
  0xc8   : > { %769 = vst.msk [vmem:[#allocation2 + $0x1c] sm:$0xf] %vm522_vm1, %v766_v9 }
  0xc9   : > { %v771_v10 = vpack.c.bf16 %v763_v8, %v763_v8 }
  0xcb   : > { %774 = vst.msk [vmem:[#allocation3 + $0x1c] sm:$0xf] %vm522_vm1, %v771_v10 }
  0xcc PF: > { %v1655_v11 = vld [vmem:[%s2300_s2 + $0x8] sm:$0xff]  ;;  %s1533_s17 = sshll.u32 %s1856_s24, 3  ;;  %v1656_v12 = vld [vmem:[#allocation2] sm:$0xff]  ;;  %vm828_vm2 = vcmask 64512   ;;  %vm803_vm3 = vcmask 261120   ;;  %s2329_s19 = scalar_lea.vmem %s2298_s0, %s2018_s26  ;;  %vm848_vm4 = vcmask 130048  }
  0xcd   : > { %v1654_v13 = vld [vmem:[%s2300_s2] sm:$0xff]  ;;  %s776_s18 = scalar_lea.vmem %s2028_s29, %s1533_s17  ;;  %813 = vmatpush.bf16.msra.mxu0 %v1655_v11  ;;  %v833_v15 = vsel %vm828_vm2, %v1656_v12, 0  ;;  %v1659_v27 = vld [vmem:[%s2300_s2 + $0x18] sm:$0xff]  ;;  %v1658_v28 = vld [vmem:[%s2300_s2 + $0x10] sm:$0xff]  ;;  %vm993_vm5 = vcmask 1043456   ;;  %s1633_s26 = sshll.u32 %s1860_s25, 1 }
  0xce   : > { %v2138_v14 = vld [vmem:[%s776_s18] sm:$0xff]  ;;  %842 = vmatpush.bf16.xpose.msra.mxu1 %v833_v15  ;;  %915 = vmatpush.bf16.msra.mxu3 %v1659_v27  ;;  %v1660_v35 = vld [vmem:[#allocation2 + $0x8] sm:$0xff]  ;;  %v1667_v57 = vld [vmem:[%s2300_s2 + $0x38] sm:$0xff]  ;;  %s1332_s21 = sadd.s32 %s1856_s24, %s1633_s26  ;;  %s2330_s23 = scalar_lea.vmem [#allocation4], %s2015_s13 }
  0xcf   : > { %v2143_v16 = vpack.c.bf16 %v2138_v14, %v2138_v14  ;;  %v1750_v17 = vld [vmem:[%s2301_s3] ss:$0 sm:$0xff]  ;;  %v935_v36 = vsel %vm828_vm2, %v1660_v35, 0  ;;  %v1752_v43 = vld [vmem:[%s2301_s3 + $0x1] ss:$0 sm:$0xff]  ;;  %v1663_v55 = vld [vmem:[%s2300_s2 + $0x28] sm:$0xff]  ;;  %s2331_s30 = smov %s2330_s23 }
  0xd0   : > { %v2156_v22 = vld [vmem:[%s2329_s19] ss:$0 sm:$0xff]  ;;  %v1661_v58 = vld [vmem:[#allocation3 + $0x8] sm:$0xff]  ;;  %v1666_v59 = vld [vmem:[%s2300_s2 + $0x30] sm:$0xff]  ;;  %s1634_s18 = sshll.u32 %s1332_s21, 3  ;;  %s1336_s20 = sshll.u32 %s2330_s23, 4  ;;  %s1337_s20 = int_to_ptr.vmem [resolvable:$true] %s1336_s20 }
  0xd1   : > { %814 = vmatpush.bf16.msra.mxu0 %v1654_v13  ;;  %v1657_v34 = vld [vmem:[#allocation3] sm:$0xff]  ;;  %v1664_v3 = vld [vmem:[#allocation2 + $0x10] sm:$0xff]  ;;  %v1668_v9 = vld [vmem:[#allocation2 + $0x18] sm:$0xff]  ;;  %s1334_s19 = scalar_lea.hbm %s2310_s12, %s1634_s18  ;;  %s2332_s26 = sand.u32 1, %s1848_s22  }
  0xd2   : > { %916 = vmatpush.bf16.msra.mxu3 %v1658_v28  ;;  %879 = vmatpush.bf16.msra.mxu2 %v1657_v34  ;;  %v886_v46 = vld [vmem:[%s2306_s8] sm:$0xf]  ;;  %v1077_v4 = vsel %vm828_vm2, %v1664_v3, 0  ;;  %v1200_v15 = vsel %vm828_vm2, %v1668_v9, 0  ;;  %s1338_s17 = sshll.u32 %s1334_s19, 4  ;;  %s1322_s21 = scalar_lea.sflag [#allocation5], %s2332_s26  ;;  %s1339_s17 = int_to_ptr.hbm [resolvable:$true] %s1338_s17 }
  0xd3   : > { %v1014_v47 = vsel %vm993_vm5, %v886_v46, 0  ;;  %v1662_v56 = vld [vmem:[%s2300_s2 + $0x20] sm:$0xff]  ;;  %s1792_s18 = sshra.s32 %s1339_s17, 4  ;;  %s1798_s27 = scalar_lea.hbm %s2310_s12, 32  ;;  %s1793_s18 = int_to_ptr.hbm [resolvable:$true] %s1792_s18 }
  0xd4   : > { %1542 = vmatmul.msk.bf16.vlgmr.msra.gmra.mxu0 %vm803_vm3, %v2143_v16  ;;  %s1794_s14 = scalar_lea.hbm %s1793_s18, 8  ;;  %p1799_p4 = scmp.lt.s32.totalorder %s1793_s18, %s2310_s12 }
  0xd5   : > { %1566 = vmatmul.msk.bf16.vlgmr.msra.gmra.mxu3 %vm803_vm3, %v2143_v16  ;;  %981 = vmatpush.bf16.msrb.mxu0 %v1661_v58  ;;  %p1795_p0 = scmp.ne.s32.totalorder %s1793_s18, %s1794_s14  ;;  %p1800_p5 = scmp.lt.s32.totalorder %s1798_s27, %s1794_s14 }
  0xd6   : > { %944 = vmatpush.bf16.xpose.msrb.mxu2 %v935_v36  ;;  %1023 = vmatpush.bf16.msrb.mxu3 %v1014_v47 }
  0xd7   : > { %p1796_p1 = pnand %p1795_p0, %p1991_p3  ;;  %p1801_p6 = por %p1800_p5, %p1799_p4 }
  0xd9   : > { %1086 = vmatpush.bf16.xpose.msra.mxu0 %v1077_v4  ;;  %p1797_p2 = pneg %p1796_p1 }
  0xdb   : > { %p1802_p7 = pnand %p1801_p6, %p1797_p2 }
 0x151   : > { %v816_v18 = vpop.f32.mrf.mxu0 }
 0x152   : > { %v817_v19 = vadd.f32 %v1750_v17, %v816_v18 }
 0x154   : > { %v820_v20 = vpack.c.bf16 %v817_v19, %v817_v19  ;;  %v1754_v19 = vld [vmem:[%s2301_s3 + $0x3] ss:$0 sm:$0xff] }
 0x156   : > { %1547 = vmatmul.msk.bf16.vlgmr.msra.gmra.mxu1 %vm828_vm2, %v820_v20 }
 0x158   : > { %v918_v37 = vpop.f32.mrf.mxu3 }
 0x159   : > { %v818_v21 = vpop.f32.mrf.mxu0  ;;  %v919_v44 = vadd.f32 %v1752_v43, %v918_v37  ;;  %v1665_v37 = vld [vmem:[#allocation3 + $0x10] sm:$0xff] }
 0x15b   : > { %v922_v45 = vpack.c.bf16 %v919_v44, %v919_v44 }
 0x160   : > { %v920_v38 = vpop.f32.mrf.mxu3 }
 0x1d3   : > { %v844_v23 = vpop.f32.mrf.mxu1 }
 0x1d4   : > { %v845_v24 = vadd.f32 %v2156_v22, %v844_v23  ;;  %v1577_v23 = vld [vmem:[%s2306_s8 + $0x4] sm:$0xf] }
 0x1d6   : > { %v849_v25 = vsel %vm848_vm4, %v845_v24, -inf }
 0x1d7   : > { %850 = vmax.xlane.f32.xlu0 %v849_v25 }
 0x1db   : > { %v846_v26 = vpop.f32.mrf.mxu1 }
 0x24a   : > { %v851_v29 = vpop.xlane.xlu0 %850 }
 0x24b   : > { %v852_v30 = vsub.f32 %v845_v24, %v851_v29  ;;  %v995_v24 = vsel %vm993_vm5, %v1577_v23, 0 }
 0x24c   : > { %1004 = vmatpush.bf16.msrb.mxu1 %v995_v24 }
 0x24d   : > { %v853_v31 = vmul.f32 1.442695, %v852_v30 }
 0x24f   : > { %1758 = vpow2.f32 %v853_v31 }
 0x250   : > { %1123 = vmatpush.bf16.msra.mxu1 %v1665_v37 }
 0x255   : > { %v1759_v32 = vpop.eup %1758 }
 0x256   : > { %v855_v33 = vsel %vm848_vm4, %v1759_v32, 0.0 }
 0x257   : > { %856 = vadd.xlane.f32.xlu0 %v855_v33 }
 0x2ca   : > { %v857_v39 = vpop.xlane.xlu0 %856 }
 0x2cb   : > { %1760 = vrcp.f32 %v857_v39 }
 0x2d1   : > { %v1761_v40 = vpop.eup %1760 }
 0x2d2   : > { %v859_v41 = vmul.f32 %v1761_v40, %v1759_v32 }
 0x2d4   : > { %v860_v42 = vpack.c.bf16 %v859_v41, %v859_v41 }
 0x2d6   : > { %1552 = vmatmul.msk.bf16.vlgmr.msra.gmra.mxu2 %vm848_vm4, %v860_v42 }
 0x2d7   : > { %1057 = vmatpush.bf16.msra.mxu2 %v1663_v55 }
 0x2db   : > { %1058 = vmatpush.bf16.msra.mxu2 %v1662_v56 }
 0x2e6   : > { %1571 = vmatmul.msk.bf16.vlgmr.msrb.gmra.mxu2 %vm828_vm2, %v922_v45 }
 0x2e7   : > { %1180 = vmatpush.bf16.msrb.mxu2 %v1667_v57 }
 0x2eb   : > { %1181 = vmatpush.bf16.msrb.mxu2 %v1666_v59  ;;  %v1630_v59 = vld [vmem:[%s2306_s8 + $0xc] sm:$0xf] }
 0x2f6   : > { %1593 = vmatmul.msk.bf16.vlgmr.msra.gmra.mxu2 %vm803_vm3, %v2143_v16 }
 0x306   : > { %1619 = vmatmul.msk.bf16.vlgmr.msrb.gmra.mxu2 %vm803_vm3, %v2143_v16  ;;  %v1753_v16 = vld [vmem:[%s2301_s3 + $0x2] ss:$0 sm:$0xff] }
 0x359   : > { %v881_v48 = vpop.f32.mrf.mxu2 }
 0x35a   : > { %v885_v49 = vpack.c.bf16 %v881_v48, %v881_v48  ;;  %v1669_v48 = vld [vmem:[#allocation3 + $0x18] sm:$0xff] }
 0x35c   : > { %1579 = vmatmul.msk.bf16.vlgmr.msrb.gmra.mxu3 %vm828_vm2, %v885_v49  ;;  %v1604_v49 = vld [vmem:[%s2306_s8 + $0x8] sm:$0xf] }
 0x361   : > { %v883_v50 = vpop.f32.mrf.mxu2 }
 0x362   : > { %v1136_v50 = vsel %vm993_vm5, %v1604_v49, 0 }
 0x363   : > { %1145 = vmatpush.bf16.msra.mxu3 %v1136_v50 }
 0x369   : > { %v946_v51 = vpop.f32.mrf.mxu2 }
 0x36a   : > { %v947_v52 = vadd.f32 %v2156_v22, %v946_v51 }
 0x36c   : > { %v950_v53 = vsel %vm848_vm4, %v947_v52, -inf }
 0x36d   : > { %951 = vmax.xlane.f32.xlu1 %v950_v53 }
 0x371   : > { %v948_v54 = vpop.f32.mrf.mxu2 }
 0x379   : > { %v1060_v5 = vpop.f32.mrf.mxu2 }
 0x37a   : > { %v1061_v17 = vadd.f32 %v1753_v16, %v1060_v5  ;;  %v1874_v16 = vmov 32.0  }
 0x37c   : > { %v1064_v18 = vpack.c.bf16 %v1061_v17, %v1061_v17 }
 0x381   : > { %v1062_v6 = vpop.f32.mrf.mxu2 }
 0x389   : > { %v1183_v7 = vpop.f32.mrf.mxu2 }
 0x38a   : > { %v1184_v20 = vadd.f32 %v1754_v19, %v1183_v7 }
 0x38c   : > { %v1187_v21 = vpack.c.bf16 %v1184_v20, %v1184_v20 }
 0x391   : > { %v1185_v11 = vpop.f32.mrf.mxu2 }
 0x3df   : > { %v2198_v60 = vpop.f32.mrf.mxu3 }
 0x3e0   : > { %v952_v61 = vpop.xlane.xlu1 %951 }
 0x3e1   : > { %v953_v62 = vsub.f32 %v947_v52, %v952_v61  ;;  %v1259_v61 = vsel %vm993_vm5, %v1630_v59, 0 }
 0x3e2   : > { %1268 = vmatpush.bf16.msrb.mxu3 %v1259_v61 }
 0x3e3   : > { %v954_v63 = vmul.f32 1.442695, %v953_v62 }
 0x3e5   : > { %1762 = vpow2.f32 %v954_v63 }
 0x3e7   : > { %v1027_v0 = vpop.f32.mrf.mxu3 }
 0x3eb   : > { %v1763_v1 = vpop.eup %1762 }
 0x3ec   : > { %v956_v2 = vsel %vm848_vm4, %v1763_v1, 0.0 }
 0x3ed   : > { %957 = vadd.xlane.f32.xlu1 %v956_v2 }
 0x460   : > { %v958_v8 = vpop.xlane.xlu1 %957 }
 0x461   : > { %1764 = vrcp.f32 %v958_v8  ;;  %v1755_v8 = vld [vmem:[%s2307_s9] ss:$0 sm:$0xff] }
 0x467   : > { %v1765_v10 = vpop.eup %1764 }
 0x468   : > { %v960_v12 = vmul.f32 %v1765_v10, %v1763_v1 }
 0x46a   : > { %v961_v13 = vpack.c.bf16 %v960_v12, %v960_v12 }
 0x46c   : > { %1576 = vmatmul.msk.bf16.vlgmr.msrb.gmra.mxu0 %vm848_vm4, %v961_v13 }
 0x46d   : > { %1209 = vmatpush.bf16.xpose.msrb.mxu0 %v1200_v15 }
 0x47c   : > { %1598 = vmatmul.msk.bf16.vlgmr.msra.gmra.mxu0 %vm828_vm2, %v1064_v18 }
 0x48c   : > { %1624 = vmatmul.msk.bf16.vlgmr.msrb.gmra.mxu0 %vm828_vm2, %v1187_v21 }
 0x4e9   : > { %v983_v25 = vpop.f32.mrf.mxu0 }
 0x4ea   : > { %v987_v26 = vpack.c.bf16 %v983_v25, %v983_v25 }
 0x4ec   : > { %1578 = vmatmul.msk.bf16.vlgmr.msrb.gmra.mxu1 %vm828_vm2, %v987_v26 }
 0x4ed   : > { %1246 = vmatpush.bf16.msrb.mxu1 %v1669_v48 }
 0x4f1   : > { %v985_v27 = vpop.f32.mrf.mxu0 }
 0x4f9   : > { %v1088_v28 = vpop.f32.mrf.mxu0 }
 0x4fa   : > { %v1089_v29 = vadd.f32 %v2156_v22, %v1088_v28 }
 0x4fc   : > { %v1092_v30 = vsel %vm848_vm4, %v1089_v29, -inf }
 0x4fd   : > { %1093 = vmax.xlane.f32.xlu2 %v1092_v30 }
 0x501   : > { %v1090_v31 = vpop.f32.mrf.mxu0 }
 0x509   : > { %v1211_v32 = vpop.f32.mrf.mxu0 }
 0x50a   : > { %v1212_v33 = vadd.f32 %v2156_v22, %v1211_v32 }
 0x50c   : > { %v1215_v34 = vsel %vm848_vm4, %v1212_v33, -inf }
 0x50d   : > { %1216 = vmax.xlane.f32.xlu2 %v1215_v34 }
 0x511   : > { %v1213_v35 = vpop.f32.mrf.mxu0 }
 0x569   : > { %v1006_v36 = vpop.f32.mrf.mxu1 }
 0x56a   : > { %v1026_v6 = vadd.f32 %v2198_v60, %v1006_v36  ;;  %v1756_v36 = vld [vmem:[%s2308_s10] ss:$0 sm:$0xff] }
 0x570   : > { %v1094_v38 = vpop.xlane.xlu2 %1093 }
 0x571   : > { %v1095_v39 = vsub.f32 %v1089_v29, %v1094_v38  ;;  %v1008_v40 = vpop.f32.mrf.mxu1 }
 0x573   : > { %v1096_v41 = vmul.f32 1.442695, %v1095_v39  ;;  %v1757_v39 = vld [vmem:[%s2309_s11] ss:$0 sm:$0xff] }
 0x575   : > { %1766 = vpow2.f32 %v1096_v41 }
 0x57b   : > { %v1767_v42 = vpop.eup %1766 }
 0x57c   : > { %v1098_v43 = vsel %vm848_vm4, %v1767_v42, 0.0 }
 0x57d   : > { %1099 = vadd.xlane.f32.xlu0 %v1098_v43 }
 0x580   : > { %v1217_v44 = vpop.xlane.xlu2 %1216 }
 0x581   : > { %v1218_v45 = vsub.f32 %v1212_v33, %v1217_v44 }
 0x583   : > { %v1219_v46 = vmul.f32 1.442695, %v1218_v45 }
 0x585   : > { %1768 = vpow2.f32 %v1219_v46 }
 0x58b   : > { %v1769_v22 = vpop.eup %1768 }
 0x58c   : > { %v1221_v47 = vsel %vm848_vm4, %v1769_v22, 0.0 }
 0x58d   : > { %1222 = vadd.xlane.f32.xlu1 %v1221_v47 }
 0x5f0   : > { %v1100_v51 = vpop.xlane.xlu0 %1099 }
 0x5f1   : > { %1770 = vrcp.f32 %v1100_v51 }
 0x5f7   : > { %v1771_v52 = vpop.eup %1770 }
 0x5f8   : > { %v1102_v53 = vmul.f32 %v1771_v52, %v1767_v42 }
 0x5fa   : > { %v1103_v54 = vpack.c.bf16 %v1102_v53, %v1102_v53 }
 0x5fc   : > { %1603 = vmatmul.msk.bf16.vlgmr.msra.gmra.mxu1 %vm848_vm4, %v1103_v54 }
 0x600   : > { %v1223_v55 = vpop.xlane.xlu1 %1222 }
 0x601   : > { %1772 = vrcp.f32 %v1223_v55 }
 0x602   : > { %1774 = vrcp.f32 %v1874_v16 }
 0x607   : > { %v1773_v56 = vpop.eup %1772 }
 0x608   : > { %v1225_v57 = vmul.f32 %v1773_v56, %v1769_v22  ;;  %v1775_v17 = vpop.eup %1774 }
 0x609   : > { %v1285_v18 = vmul.f32 32.0, %v1775_v17  ;;  %vm1289_vm6 = vweird.f32 %v1775_v17 }
 0x60a   : > { %v1226_v58 = vpack.c.bf16 %v1225_v57, %v1225_v57 }
 0x60b   : > { %v1286_v19 = vsub.f32 1.0, %v1285_v18 }
 0x60c   : > { %1629 = vmatmul.msk.bf16.vlgmr.msrb.gmra.mxu1 %vm848_vm4, %v1226_v58 }
 0x60d   : > { %v1287_v60 = vmul.f32 %v1775_v17, %v1286_v19 }
 0x60f   : > { %v1288_v20 = vadd.f32 %v1775_v17, %v1287_v60 }
 0x611   : > { %v1290_v21 = vsel %vm1289_vm6, %v1775_v17, %v1288_v20 }
 0x679   : > { %v1125_v62 = vpop.f32.mrf.mxu1 }
 0x67a   : > { %v1129_v63 = vpack.c.bf16 %v1125_v62, %v1125_v62 }
 0x67c   : > { %1605 = vmatmul.msk.bf16.vlgmr.msra.gmra.mxu3 %vm828_vm2, %v1129_v63 }
 0x681   : > { %v1127_v0 = vpop.f32.mrf.mxu1 }
 0x689   : > { %v1248_v1 = vpop.f32.mrf.mxu1 }
 0x68a   : > { %v1252_v2 = vpack.c.bf16 %v1248_v1, %v1248_v1 }
 0x68c   : > { %1631 = vmatmul.msk.bf16.vlgmr.msrb.gmra.mxu3 %vm828_vm2, %v1252_v2 }
 0x691   : > { %v1250_v3 = vpop.f32.mrf.mxu1 }
 0x6ff   : > { %v1147_v4 = vpop.f32.mrf.mxu3 }
 0x700   : > { %v1151_v7 = vadd.f32 %v1147_v4, %v1026_v6 }
 0x707   : > { %v1149_v5 = vpop.f32.mrf.mxu3 }
 0x70f   : > { %v1270_v9 = vpop.f32.mrf.mxu3 }
 0x710   : > { %v1274_v10 = vadd.f32 %v1270_v9, %v1151_v7 }
 0x712   : > { %v1279_v11 = vadd.f32 %v1755_v8, %v1274_v10 }
 0x714   : > { %v1280_v12 = vadd.f32 %v1279_v11, %v2138_v14 }
 0x716   : > { %v1281_v13 = vsel %vm803_vm3, %v1280_v12, 0.0 }
 0x717   : > { %1282 = vadd.xlane.f32.xlu2 %v1281_v13  ;;  %v1272_v15 = vpop.f32.mrf.mxu3 }
 0x78a   : > { %v1283_v23 = vpop.xlane.xlu2 %1282 }
 0x78b   : > { %v1291_v24 = vmul.f32 %v1290_v21, %v1283_v23 }
 0x78d   : > { %v1292_v25 = vsub.f32 %v1280_v12, %v1291_v24 }
 0x78f   : > { %v1293_v26 = vmul.f32 %v1292_v25, %v1292_v25 }
 0x791   : > { %v1294_v14 = vsel %vm803_vm3, %v1293_v26, 0.0 }
 0x792   : > { %1295 = vadd.xlane.f32.xlu0 %v1294_v14 }
 0x805   : > { %v1296_v27 = vpop.xlane.xlu0 %1295 }
 0x806   : > { %v1297_v28 = vmul.f32 %v1296_v27, %v1290_v21 }
 0x808   : > { %v1298_v29 = vadd.f32 1e-12, %v1297_v28 }
 0x80a   : > { %1776 = vrsqrt.f32 %v1298_v29  ;;  %vm1305_vm8 = vweird.f32 %v1298_v29 }
 0x810   : > { %v1777_v30 = vpop.eup %1776 }
 0x811   : > { %v1300_v31 = vmul.f32 %v1777_v30, %v1298_v29  ;;  %vm1306_vm7 = vweird.f32 %v1777_v30 }
 0x812   : > { %vm1307_vm9 = vmor %vm1305_vm8, %vm1306_vm7 }
 0x813   : > { %v1301_v32 = vmul.f32 %v1777_v30, %v1300_v31 }
 0x815   : > { %v1302_v33 = vmul.f32 0.5, %v1301_v32 }
 0x817   : > { %v1303_v34 = vsub.f32 1.5, %v1302_v33 }
 0x819   : > { %v1304_v35 = vmul.f32 %v1777_v30, %v1303_v34 }
 0x81b   : > { %v1308_v37 = vsel %vm1307_vm9, %v1777_v30, %v1304_v35 }
 0x81c   : > { %v1309_v38 = vmul.f32 %v1308_v37, %v1292_v25 }
 0x81e   : > { %v1314_v40 = vmul.f32 %v1756_v36, %v1309_v38 }
 0x820   : > { %v1319_v41 = vadd.f32 %v1757_v39, %v1314_v40 }
 0x822   : > { %1320 = vst.msk [vmem:[%s2331_s30] sm:$0xff] %vm803_vm3, %v1319_v41 }
 0x823   : > { %1805 = shalt.err (!%p1802_p7)
}
 0x824   : > { %1670 = dma.vmem_to_hbm [thread:$0]  (%p1991_p3), %s1337_s20, 128, %s1339_s17, %s1322_s21  }
 0x825 PF: > { %s2333_s13 = sld [smem:[#allocation7_spill]]  ;;  %p1676_p9 = scmp.ge.s32.totalorder %s1872_s28, 2 }
 0x827   : > { %p1673_p10 = pnand %p1676_p9, %p2000_p8 }
 0x829   : > { %p1674_p11 = pneg %p1673_p10 }
 0x82b   : > { %s1350_s23 = sand.u32 1, %s2333_s13  }
 0x82c   : > { %s1351_s30 = scalar_lea.sflag [#allocation5], %s1350_s23 }
 0x82d   : > { %1839 = dma.done.wait (%p1674_p11), %s1351_s30, 128  }
 0x82e   : > { %1841 = vsyncadd (%p1674_p11), %s1351_s30, 4294967168  ;;  %s25_s28 = sadd.s32 1, %s1872_s28   ;;  %s2335_s26 = sld [smem:[#allocation8_spill]] }
 0x82f   : > { %p22_p12 = scmp.ge.s32.totalorder %s25_s28, 6   ;;  %s2336_s23 = sld [smem:[#allocation14_spill]] }
 0x830   : > { %s2337_s24 = sld [smem:[#allocation9_spill]]  ;;  %s2341_s21 = smov %s1848_s22 }
 0x831   : > { %s2338_s25 = sld [smem:[#allocation10_spill]] }
 0x832   : > { %s2339_s16 = sld [smem:[#allocation11_spill]] }
 0x833   : > { %s2340_s27 = sld [smem:[#allocation12_spill]] }
 0x834   : > { %s2342_s22 = smov %s2335_s26  ;;  %24 = sbr.rel (!%p22_p12) target bundleno = 5 (0x5), region = 144 }
 0x838   : > { %s2343_s26 = smov %s2339_s16 }
 0x839   :  { %1357 = vsyncpa [#allocation5], 1 }
 0x83a   :  { %1359 = vsyncpa [#allocation5 + $0x1], 1 }

</bundles_post_ra>
